<compile_context>
chip_gen: v7x
topology: tpu7x:2x2x1
jax: 0.10.0
libtpu: 0.0.40
codegen_flags: <defaults>
</compile_context>

<pallas_src>
import jax
import jax.numpy as jnp
from jax import lax
from jax.experimental import pallas as pl
from jax.experimental.pallas import tpu as pltpu

# consts.MLP_LEAKY_SLOPE is not provided in the snippet; 0.2 is used here.
# NOTE: torch.nn.LeakyReLU default slope is 0.01 — set this to the real
# consts.MLP_LEAKY_SLOPE when integrating.
MLP_LEAKY_SLOPE = 0.2


def lfa_kernel(geom_ref, idx_ref, wbig_ref, bbig_ref, smean_ref, feat_ref, out_ref):
    # geom_ref : (tn, K*4)              packed geometric features (lane-dense)
    # idx_ref  : (tn, K) int32          neighbor indices into the feature table
    # wbig_ref : (K*4, K*d_lfa)         block-diagonal kron(I_K, W)
    # bbig_ref : (1, K*d_lfa)           bias tiled K times
    # smean_ref: (K*d_lfa, d_out)       mean-over-K fold (1/K), right-padded zeros
    # feat_ref : (N, d_out)             feature table * 1/K, left-padded zeros
    # out_ref  : (tn, d_out)
    tn = geom_ref.shape[0]
    K = idx_ref.shape[1]
    n_feat = feat_ref.shape[0]

    # ---- geom path: per-neighbor Linear(4, d_lfa) + LeakyReLU --------------
    z = jnp.dot(geom_ref[...], wbig_ref[...],
                preferred_element_type=jnp.float32) + bbig_ref[...]
    z = jnp.maximum(z, MLP_LEAKY_SLOPE * z)            # LeakyReLU (0 < slope < 1)

    # ---- gather path: raw neighbor counts (1/K folded into feat_ref) -------
    idx = idx_ref[...]
    col = lax.broadcasted_iota(jnp.int32, (tn, n_feat), 1)   # hoisted once
    counts = (idx[:, 0:1] == col).astype(jnp.float32)
    for k in range(1, K):                                     # K static -> unrolled
        counts = counts + (idx[:, k:k + 1] == col).astype(jnp.float32)

    # ---- fused output: two zero-padded matmuls, one unmasked full-lane store
    out = jnp.dot(z, smean_ref[...], preferred_element_type=jnp.float32)
    out = out + jnp.dot(counts, feat_ref[...], preferred_element_type=jnp.float32)
    out_ref[...] = out.astype(out_ref.dtype)


def _pick_tile(n_rows, *, max_tn=256, min_tn=64, min_steps=8):
    """Row tile + padded row count.

    Tile is a multiple of 8 (sublanes), in [min_tn, max_tn], chosen so the grid
    has >= min_steps iterations when possible (>= min_steps//2 pipeline steps
    per v7x TensorCore).  Rows are padded to a whole number of tiles, with at
    least 2 tiles so both v7x cores get work.
    """
    tn = (n_rows // min_steps) // 8 * 8
    tn = max(min_tn, min(max_tn, tn))
    n_tiles = max(2, pl.cdiv(n_rows, tn))
    return tn, n_tiles * tn


def _vmem_limit_bytes():
    """Generation-aware scoped-VMEM budget (~48 MiB on v7x, ~96 MiB on v5e/v6e)."""
    try:
        cap = pltpu.get_tpu_info().vmem_capacity_bytes
    except Exception:  # pragma: no cover - conservative fallback
        cap = 64 * 1024 * 1024
    return min(int(cap * 3 // 4), 100 * 1024 * 1024)


def lfa_forward(input_features, geom_features, closest_indices, w, b,
                *, max_tn=256):
    N, K, fin = geom_features.shape
    n_feat, d_in = input_features.shape
    assert n_feat == N
    d_lfa = w.shape[1]
    d_out = d_lfa + d_in

    tn, n_pad = _pick_tile(N, max_tn=max_tn)
    grid = (n_pad // tn,)

    # Host-side repacking (cheap, done by XLA outside the kernel).
    geom2 = geom_features.reshape(N, K * fin)                       # lane-dense block
    idx = closest_indices.astype(jnp.int32)
    if n_pad != N:
        geom2 = jnp.pad(geom2, ((0, n_pad - N), (0, 0)))
        idx = jnp.pad(idx, ((0, n_pad - N), (0, 0)))                # pad idx with 0 (valid)

    inv_k = 1.0 / K
    wbig = jnp.kron(jnp.eye(K, dtype=w.dtype), w)                   # (K*fin, K*d_lfa)
    bbig = jnp.tile(b.reshape(1, d_lfa), (1, K))                    # (1, K*d_lfa)
    smean = jnp.kron(jnp.ones((K, 1), dtype=w.dtype),
                     jnp.eye(d_lfa, dtype=w.dtype)) * inv_k         # (K*d_lfa, d_lfa)
    # Zero-pad both RHS operands to full output width so each matmul produces a
    # full-128-lane (tn, d_out) result and no in-kernel concat is needed.
    smean_pad = jnp.pad(smean, ((0, 0), (0, d_in)))                 # (K*d_lfa, d_out)
    feat_pad = jnp.pad(input_features * inv_k, ((0, 0), (d_lfa, 0)))  # (N, d_out), 1/K folded

    out_shape = jax.ShapeDtypeStruct((n_pad, d_out), jnp.float32)
    grid_spec = pltpu.PrefetchScalarGridSpec(
        num_scalar_prefetch=0,
        grid=grid,
        in_specs=[
            pl.BlockSpec((tn, K * fin), lambda i: (i, 0)),          # packed geom block
            pl.BlockSpec((tn, K), lambda i: (i, 0)),                # index block
            pl.BlockSpec((K * fin, K * d_lfa), lambda i: (0, 0)),   # block-diag weight
            pl.BlockSpec((1, K * d_lfa), lambda i: (0, 0)),         # tiled bias
            pl.BlockSpec((K * d_lfa, d_out), lambda i: (0, 0)),     # mean-fold (padded)
            pl.BlockSpec((N, d_out), lambda i: (0, 0)),             # feat table (padded, resident)
        ],
        out_specs=pl.BlockSpec((tn, d_out), lambda i: (i, 0)),
    )
    out = pl.pallas_call(
        lfa_kernel,
        out_shape=out_shape,
        grid_spec=grid_spec,
        compiler_params=pltpu.CompilerParams(
            dimension_semantics=("parallel",),        # row axis shards across TCs
            vmem_limit_bytes=_vmem_limit_bytes(),
        ),
    )(geom2, idx, wbig, bbig, smean_pad, feat_pad)
    return out[:N]


def lfa_reference(input_features, geom_features, closest_indices, w, b):
    z = jnp.einsum("nkf,fd->nkd", geom_features, w) + b.reshape(1, 1, -1)
    z = jnp.where(z >= 0, z, MLP_LEAKY_SLOPE * z)
    rel = input_features[closest_indices]                     # (N, K, d_in)
    comb = jnp.concatenate([z, rel], axis=-1)
    return jnp.mean(comb, axis=1)


if __name__ == "__main__":
    key = jax.random.PRNGKey(0)
    k1, k2, k3, k4, k5 = jax.random.split(key, 5)

    # Small point-cloud-ish shapes; d_lfa + d_in = 128 -> lane-dense output.
    N, K, d_lfa, d_in = 512, 8, 64, 64

    input_features = jax.random.normal(k1, (N, d_in), dtype=jnp.float32)
    geom_features = jax.random.normal(k2, (N, K, 4), dtype=jnp.float32)
    closest_indices = jax.random.randint(k3, (N, K), 0, N, dtype=jnp.int32)

    # "Linear(4, d_lfa)" params (torch stores W as (d_lfa, 4); passed transposed).
    w = (jax.random.uniform(k4, (4, d_lfa), dtype=jnp.float32) - 0.5) * 0.5
    b = (jax.random.uniform(k5, (1, d_lfa), dtype=jnp.float32) - 0.5) * 0.5

    out = lfa_forward(input_features, geom_features, closest_indices, w, b)
    out = jax.block_until_ready(out)

    ref = lfa_reference(input_features, geom_features, closest_indices, w, b)
    assert out.shape == (N, d_lfa + d_in)
    assert jnp.allclose(out, ref, rtol=1e-4, atol=1e-4), "mismatch vs reference"

    print("KERNEL_OK")
</pallas_src>

<mosaic_0001>
module attributes {stable_mosaic.version = 11 : i64} {
  func.func @lfa_kernel(%arg0: i32, %arg1: memref<64x32xf32, #tpu.memory_space<vmem>>, %arg2: memref<64x8xi32, #tpu.memory_space<vmem>>, %arg3: memref<32x512xf32, #tpu.memory_space<vmem>>, %arg4: memref<1x512xf32, #tpu.memory_space<vmem>>, %arg5: memref<512x128xf32, #tpu.memory_space<vmem>>, %arg6: memref<512x128xf32, #tpu.memory_space<vmem>>, %arg7: memref<64x128xf32, #tpu.memory_space<vmem>>) attributes {dimension_semantics = [#tpu.dimension_semantics<parallel>], iteration_bounds = array<i64: 8>, scalar_prefetch = 0 : i64, scratch_operands = 0 : i64, tpu.core_type = #tpu.core_type<tc>, window_params = [{transform_indices = @transform_0, window_bounds = array<i64: 64, 32>}, {transform_indices = @transform_1, window_bounds = array<i64: 64, 8>}, {pipeline_mode = #tpu.pipeline_mode<synchronous>, transform_indices = @transform_2, window_bounds = array<i64: 32, 512>}, {pipeline_mode = #tpu.pipeline_mode<synchronous>, transform_indices = @transform_3, window_bounds = array<i64: 1, 512>}, {pipeline_mode = #tpu.pipeline_mode<synchronous>, transform_indices = @transform_4, window_bounds = array<i64: 512, 128>}, {pipeline_mode = #tpu.pipeline_mode<synchronous>, transform_indices = @transform_5, window_bounds = array<i64: 512, 128>}, {transform_indices = @transform_6, window_bounds = array<i64: 64, 128>}]} {
    %c0 = arith.constant 0 : index
    %c0_0 = arith.constant 0 : index
    %0 = vector.load %arg1[%c0, %c0_0] : memref<64x32xf32, #tpu.memory_space<vmem>>, vector<64x32xf32>
    %c0_1 = arith.constant 0 : index
    %c0_2 = arith.constant 0 : index
    %1 = vector.load %arg3[%c0_1, %c0_2] : memref<32x512xf32, #tpu.memory_space<vmem>>, vector<32x512xf32>
    %cst = arith.constant dense<0.000000e+00> : vector<64x512xf32>
    %2 = tpu.matmul %0, %1, %cst {dimension_numbers = #tpu.dot_dimension_numbers<[1], [0], [0], [1], [0, 0, 1, 1], [], []>} : vector<64x32xf32>, vector<32x512xf32>, vector<64x512xf32> -> vector<64x512xf32>
    %c0_3 = arith.constant 0 : index
    %c0_4 = arith.constant 0 : index
    %3 = vector.load %arg4[%c0_3, %c0_4] : memref<1x512xf32, #tpu.memory_space<vmem>>, vector<1x512xf32>
    %4 = vector.broadcast %3 : vector<1x512xf32> to vector<64x512xf32>
    %5 = arith.addf %2, %4 : vector<64x512xf32>
    %cst_5 = arith.constant 2.000000e-01 : f32
    %6 = vector.broadcast %cst_5 : f32 to vector<64x512xf32>
    %7 = arith.mulf %6, %5 : vector<64x512xf32>
    %8 = arith.maximumf %5, %7 : vector<64x512xf32>
    %c0_6 = arith.constant 0 : index
    %c0_7 = arith.constant 0 : index
    %9 = vector.load %arg2[%c0_6, %c0_7] : memref<64x8xi32, #tpu.memory_space<vmem>>, vector<64x8xi32>
    %10 = tpu.iota {dimensions = array<i32: 1>} : vector<64x512xi32>
    %11 = vector.extract_strided_slice %9 {offsets = [0, 0], sizes = [64, 1], strides = [1, 1]} : vector<64x8xi32> to vector<64x1xi32>
    %12 = vector.broadcast %11 : vector<64x1xi32> to vector<64x512xi32>
    %13 = arith.cmpi eq, %12, %10 : vector<64x512xi32>
    %14 = arith.extui %13 : vector<64x512xi1> to vector<64x512xi32>
    %15 = arith.sitofp %14 : vector<64x512xi32> to vector<64x512xf32>
    %16 = vector.extract_strided_slice %9 {offsets = [0, 1], sizes = [64, 1], strides = [1, 1]} : vector<64x8xi32> to vector<64x1xi32>
    %17 = vector.broadcast %16 : vector<64x1xi32> to vector<64x512xi32>
    %18 = arith.cmpi eq, %17, %10 : vector<64x512xi32>
    %19 = arith.extui %18 : vector<64x512xi1> to vector<64x512xi32>
    %20 = arith.sitofp %19 : vector<64x512xi32> to vector<64x512xf32>
    %21 = arith.addf %15, %20 : vector<64x512xf32>
    %22 = vector.extract_strided_slice %9 {offsets = [0, 2], sizes = [64, 1], strides = [1, 1]} : vector<64x8xi32> to vector<64x1xi32>
    %23 = vector.broadcast %22 : vector<64x1xi32> to vector<64x512xi32>
    %24 = arith.cmpi eq, %23, %10 : vector<64x512xi32>
    %25 = arith.extui %24 : vector<64x512xi1> to vector<64x512xi32>
    %26 = arith.sitofp %25 : vector<64x512xi32> to vector<64x512xf32>
    %27 = arith.addf %21, %26 : vector<64x512xf32>
    %28 = vector.extract_strided_slice %9 {offsets = [0, 3], sizes = [64, 1], strides = [1, 1]} : vector<64x8xi32> to vector<64x1xi32>
    %29 = vector.broadcast %28 : vector<64x1xi32> to vector<64x512xi32>
    %30 = arith.cmpi eq, %29, %10 : vector<64x512xi32>
    %31 = arith.extui %30 : vector<64x512xi1> to vector<64x512xi32>
    %32 = arith.sitofp %31 : vector<64x512xi32> to vector<64x512xf32>
    %33 = arith.addf %27, %32 : vector<64x512xf32>
    %34 = vector.extract_strided_slice %9 {offsets = [0, 4], sizes = [64, 1], strides = [1, 1]} : vector<64x8xi32> to vector<64x1xi32>
    %35 = vector.broadcast %34 : vector<64x1xi32> to vector<64x512xi32>
    %36 = arith.cmpi eq, %35, %10 : vector<64x512xi32>
    %37 = arith.extui %36 : vector<64x512xi1> to vector<64x512xi32>
    %38 = arith.sitofp %37 : vector<64x512xi32> to vector<64x512xf32>
    %39 = arith.addf %33, %38 : vector<64x512xf32>
    %40 = vector.extract_strided_slice %9 {offsets = [0, 5], sizes = [64, 1], strides = [1, 1]} : vector<64x8xi32> to vector<64x1xi32>
    %41 = vector.broadcast %40 : vector<64x1xi32> to vector<64x512xi32>
    %42 = arith.cmpi eq, %41, %10 : vector<64x512xi32>
    %43 = arith.extui %42 : vector<64x512xi1> to vector<64x512xi32>
    %44 = arith.sitofp %43 : vector<64x512xi32> to vector<64x512xf32>
    %45 = arith.addf %39, %44 : vector<64x512xf32>
    %46 = vector.extract_strided_slice %9 {offsets = [0, 6], sizes = [64, 1], strides = [1, 1]} : vector<64x8xi32> to vector<64x1xi32>
    %47 = vector.broadcast %46 : vector<64x1xi32> to vector<64x512xi32>
    %48 = arith.cmpi eq, %47, %10 : vector<64x512xi32>
    %49 = arith.extui %48 : vector<64x512xi1> to vector<64x512xi32>
    %50 = arith.sitofp %49 : vector<64x512xi32> to vector<64x512xf32>
    %51 = arith.addf %45, %50 : vector<64x512xf32>
    %52 = vector.extract_strided_slice %9 {offsets = [0, 7], sizes = [64, 1], strides = [1, 1]} : vector<64x8xi32> to vector<64x1xi32>
    %53 = vector.broadcast %52 : vector<64x1xi32> to vector<64x512xi32>
    %54 = arith.cmpi eq, %53, %10 : vector<64x512xi32>
    %55 = arith.extui %54 : vector<64x512xi1> to vector<64x512xi32>
    %56 = arith.sitofp %55 : vector<64x512xi32> to vector<64x512xf32>
    %57 = arith.addf %51, %56 : vector<64x512xf32>
    %c0_8 = arith.constant 0 : index
    %c0_9 = arith.constant 0 : index
    %58 = vector.load %arg5[%c0_8, %c0_9] : memref<512x128xf32, #tpu.memory_space<vmem>>, vector<512x128xf32>
    %cst_10 = arith.constant dense<0.000000e+00> : vector<64x128xf32>
    %59 = tpu.matmul %8, %58, %cst_10 {dimension_numbers = #tpu.dot_dimension_numbers<[1], [0], [0], [1], [0, 0, 1, 1], [], []>} : vector<64x512xf32>, vector<512x128xf32>, vector<64x128xf32> -> vector<64x128xf32>
    %c0_11 = arith.constant 0 : index
    %c0_12 = arith.constant 0 : index
    %60 = vector.load %arg6[%c0_11, %c0_12] : memref<512x128xf32, #tpu.memory_space<vmem>>, vector<512x128xf32>
    %cst_13 = arith.constant dense<0.000000e+00> : vector<64x128xf32>
    %61 = tpu.matmul %57, %60, %cst_13 {dimension_numbers = #tpu.dot_dimension_numbers<[1], [0], [0], [1], [0, 0, 1, 1], [], []>} : vector<64x512xf32>, vector<512x128xf32>, vector<64x128xf32> -> vector<64x128xf32>
    %62 = arith.addf %59, %61 : vector<64x128xf32>
    %c0_14 = arith.constant 0 : index
    %c0_15 = arith.constant 0 : index
    %63 = vector.load %arg7[%c0_14, %c0_15] : memref<64x128xf32, #tpu.memory_space<vmem>>, vector<64x128xf32>
    tpu.vector_store %arg7[%c0_14, %c0_15], %62 {strides = array<i32>} : memref<64x128xf32, #tpu.memory_space<vmem>>, vector<64x128xf32>,
    return
  }
  func.func @transform_0(%arg0: i32) -> (i32, i32) {
    %c0_i32 = arith.constant 0 : i32
    %c0_i32_0 = arith.constant 0 : i32
    return %arg0, %c0_i32 : i32, i32
  }
  func.func @transform_1(%arg0: i32) -> (i32, i32) {
    %c0_i32 = arith.constant 0 : i32
    %c0_i32_0 = arith.constant 0 : i32
    return %arg0, %c0_i32 : i32, i32
  }
  func.func @transform_2(%arg0: i32) -> (i32, i32) {
    %c0_i32 = arith.constant 0 : i32
    %c0_i32_0 = arith.constant 0 : i32
    %c0_i32_1 = arith.constant 0 : i32
    return %c0_i32, %c0_i32_0 : i32, i32
  }
  func.func @transform_3(%arg0: i32) -> (i32, i32) {
    %c0_i32 = arith.constant 0 : i32
    %c0_i32_0 = arith.constant 0 : i32
    %c0_i32_1 = arith.constant 0 : i32
    return %c0_i32, %c0_i32_0 : i32, i32
  }
  func.func @transform_4(%arg0: i32) -> (i32, i32) {
    %c0_i32 = arith.constant 0 : i32
    %c0_i32_0 = arith.constant 0 : i32
    %c0_i32_1 = arith.constant 0 : i32
    return %c0_i32, %c0_i32_0 : i32, i32
  }
  func.func @transform_5(%arg0: i32) -> (i32, i32) {
    %c0_i32 = arith.constant 0 : i32
    %c0_i32_0 = arith.constant 0 : i32
    %c0_i32_1 = arith.constant 0 : i32
    return %c0_i32, %c0_i32_0 : i32, i32
  }
  func.func @transform_6(%arg0: i32) -> (i32, i32) {
    %c0_i32 = arith.constant 0 : i32
    %c0_i32_0 = arith.constant 0 : i32
    return %arg0, %c0_i32 : i32, i32
  }
}

</mosaic_0001>

<bundles_post_ra>
// kernel: tpu_custom_call.1
= control target key start
LH: loop header
LB: loop body
LE: loop exit
PB: predicated region body
PF: predicated region fallthrough
CT: control target
= control target key end

     0   :  { %11 = vsyncpa [#allocation3], 0  ;;  %s5716_s0 = inlined_call_operand.vmem [shape: f32[512,32], index: 0, kind: input, shape index: {}]   ;;  %s5717_s1 = inlined_call_operand.vmem [shape: s32[512,8], index: 1, kind: input, shape index: {}]   ;;  %s5718_s2 = inlined_call_operand.vmem [shape: f32[32,512], index: 2, kind: input, shape index: {}]   ;;  %s5719_s3 = inlined_call_operand.vmem [shape: f32[1,512], index: 3, kind: input, shape index: {}]   ;;  %s5720_s4 = inlined_call_operand.vmem [shape: f32[512,128], index: 4, kind: input, shape index: {}]   ;;  %s5721_s5 = inlined_call_operand.vmem [shape: f32[512,128], index: 5, kind: input, shape index: {}]   ;;  %s5722_s6 = inlined_call_operand.hbm [shape: f32[512,128], index: 6, kind: output, shape index: {}]  }
   0x1   :  { %13 = vsyncpa [#allocation3 + $0x1], 0  ;;  %s3345_s21 = smov 0   ;;  %s3347_s22 = smov 0  }
   0x2   :  { %s3349_s23 = smov 0   ;;  %s3351_s24 = smov 0  }
   0x3 LB: > { %s3366_s25 = sadd.s32 4294967295, %s3296_s24   ;;  %s2477_s26 = sadd.s32 4294967294, %s3296_s24   ;;  %s3296_s24 = sphi %s3351_s24, %s5871_s24   ;;  %s3292_s23 = sphi %s3349_s23, %s5870_s23   ;;  %s3288_s22 = sphi %s3347_s22, %s5869_s22   ;;  %s3284_s21 = sphi %s3345_s21, %s5868_s21  }
   0x4   : > { %s3370_s27 = sadd.s32 1, %s3296_s24   ;;  %s162_s28 = sadd.s32 1, %s3292_s23 }
   0x5   : > { %s159_s29 = ssub.s32 %s3296_s24, %s3370_s27  ;;  %p172_p0 = scmp.ne.s32.totalorder %s3292_s23, %s3288_s22 }
   0x6   : > { %p160_p1 = scmp.eq.s32.totalorder %s159_s29, 0  ;;  %p173_p2 = scmp.eq.s32.totalorder %s3366_s25, 7 }
   0x7   : > { %p178_p3 = scmp.ne.s32.totalorder %s3288_s22, %s3284_s21  ;;  %p179_p4 = scmp.eq.s32.totalorder %s2477_s26, 7 }
   0x8   : > { %s3381_s30 = scalar_select %p160_p1, %s3292_s23, %s162_s28  }
   0x9   : > { %p3383_p5 = por %p173_p2, %p172_p0  ;;  %p3387_p6 = por %p179_p4, %p178_p3 }
   0xa   : > { %p2480_p7 = scmp.ge.s32.totalorder %s3296_s24, 1  ;;  %p227_p8 = scmp.lt.s32.totalorder %s3296_s24, 9 }
   0xc   : > { %p228_p9 = pnand %p2480_p7, %p227_p8 }
   0xe   : > { %231 = sbr.rel (%p228_p9) target bundleno = 631 (0x277), region = 44 }
  0x15   : > { %s2482_s9 = sshll.u32 %s3366_s25, 3  ;;  %v284_v0 = vld [vmem:[%s5718_s2 + $0x8] sm:$0xff]  ;;  %v5724_v1 = vmov 5   ;;  %v3299_v2 = vmov 2   ;;  %v283_v5 = vld [vmem:[%s5718_s2] sm:$0xff]  ;;  %v286_v7 = vld [vmem:[%s5718_s2 + $0x18] sm:$0xff] }
  0x16   : > { %3189 = vset.pattern.permute.xlu0 %v5724_v1  ;;  %3182 = vset.pattern.permute.xlu1 %v3299_v2  ;;  %p263_p10 = scmp.lt.s32.totalorder %s2482_s9, 63  ;;  %v288_v3 = vld [vmem:[%s5718_s2 + $0x28] sm:$0xff]  ;;  %v287_v6 = vld [vmem:[%s5718_s2 + $0x20] sm:$0xff]  ;;  %v290_v9 = vld [vmem:[%s5718_s2 + $0x38] sm:$0xff]  ;;  %v5730_v12 = vmov 0.0   ;;  %vm321_vm0 = vcmask 261120  }
  0x17   : > { %v2988_v4 = vpack.c.bf16 %v288_v3, %v284_v0  ;;  %v2990_v8 = vpack.c.bf16 %v287_v6, %v283_v5  ;;  %v285_v10 = vld [vmem:[%s5718_s2 + $0x10] sm:$0xff]  ;;  %410 = vmatprep.mubr.f32.mxu0 %v5730_v12  ;;  %523 = vmatprep.mubr.f32.mxu1 %v5730_v12  ;;  %v2996_v13 = vpack.c.bf16 %v290_v9, %v286_v7  ;;  %v292_v15 = vld [vmem:[%s5718_s2 + $0x48] sm:$0xff]  ;;  %v291_v17 = vld [vmem:[%s5718_s2 + $0x40] sm:$0xff]  ;;  %v3301_v31 = vmov 0   ;;  %s259_s14 = sand.u32 1, %s3288_s22   ;;  %s2763_s17 = sshll.u32 %s3366_s25, 10 }
  0x18   : > { %s5873_s9 = smov (!%p263_p10, %s2482_s9), 63  ;;  %v289_v11 = vld [vmem:[%s5718_s2 + $0x30] sm:$0xff]  ;;  %v296_v16 = vld [vmem:[%s5718_s2 + $0x68] sm:$0xff]  ;;  %v295_v19 = vld [vmem:[%s5718_s2 + $0x60] sm:$0xff]  ;;  %v3302_v33 = vmov 1   ;;  %v5726_v37 = vmov 7   ;;  %s5668_s26 = scalar_lea.hbm %s5722_s6, %s2763_s17 }
  0x19   : > { %2989 = vmatprep.subr.bf16.mxu0 %v2988_v4  ;;  %v2998_v14 = vpack.c.bf16 %v289_v11, %v285_v10  ;;  %s2483_s18 = sshll.u32 %s5873_s9, 3  ;;  %v2992_v18 = vpack.c.bf16 %v296_v16, %v292_v15  ;;  %v294_v20 = vld [vmem:[%s5718_s2 + $0x58] sm:$0xff]  ;;  %2997 = vmatprep.subr.bf16.mxu1 %v2996_v13  ;;  %v2994_v22 = vpack.c.bf16 %v295_v19, %v291_v17  ;;  %v293_v24 = vld [vmem:[%s5718_s2 + $0x50] sm:$0xff]  ;;  %v5725_v38 = vmov 4   ;;  %v1913_v46 = vld [vmem:[%s5721_s5 + $0x80] sm:$0xff]  ;;  %s2481_s15 = sshll.u32 %s259_s14, 6 }
  0x1a   : > { %2991 = vmatpush1.bf16.msra.mxu0 %v2990_v8  ;;  %v298_v21 = vld [vmem:[%s5718_s2 + $0x78] sm:$0xff]  ;;  %s3446_s13 = scalar_lea.vmem %s5717_s1, %s2483_s18  ;;  %v297_v25 = vld [vmem:[%s5718_s2 + $0x70] sm:$0xff]  ;;  %s3460_s20 = scalar_lea.vmem %s5716_s0, %s2483_s18  ;;  %v5729_v40 = vmov 6   ;;  %v5728_v44 = vmov 3   ;;  %v1914_v47 = vld [vmem:[%s5721_s5 + $0x88] sm:$0xff] }
  0x1b   : > { %v3000_v23 = vpack.c.bf16 %v298_v21, %v294_v20  ;;  %v3455_v26 = vld [vmem:[%s3446_s13] sm:$0xff]  ;;  %2999 = vmatpush1.bf16.msra.mxu1 %v2998_v14  ;;  %2993 = vmatprep.subr.bf16.mxu0 %v2992_v18  ;;  %v3002_v27 = vpack.c.bf16 %v297_v25, %v293_v24  ;;  %v3465_v28 = vld [vmem:[%s3446_s13 + $0x10] sm:$0xff]  ;;  %v3468_v29 = vld [vmem:[%s3446_s13 + $0x8] sm:$0xff]  ;;  %v3004_v49 = vpack.c.bf16 %v1914_v47, %v1913_v46  ;;  %s5648_s16 = scalar_lea.vmem [#allocation2], %s2481_s15  ;;  %s5675_s28 = scalar_lea.sflag [#allocation3], %s259_s14 }
  0x1c   : > { %1378 = vperm.xlu0 %3189, %v3455_v26   ;;  %922 = vperm.xlu1 %3182, %v3455_v26   ;;  %v275_v30 = vld [vmem:[%s3460_s20] sm:$0xff]  ;;  %v276_v32 = vld [vmem:[%s3460_s20 + $0x8] sm:$0xff]  ;;  %v277_v35 = vld [vmem:[%s3460_s20 + $0x10] sm:$0xff]  ;;  %s2403_s19 = sshll.u32 %s5648_s16, 4  ;;  %s3307_s29 = smov [#allocation2]   ;;  %s5670_s19 = int_to_ptr.vmem [resolvable:$true] %s2403_s19 }
  0x1d   : > { %3001 = vmatprep.subr.bf16.mxu1 %v3000_v23  ;;  %v3484_v34 = vld [vmem:[%s3446_s13 + $0x28] sm:$0xff]  ;;  %v278_v36 = vld [vmem:[%s3460_s20 + $0x18] sm:$0xff]  ;;  %v279_v39 = vld [vmem:[%s3460_s20 + $0x20] sm:$0xff]  ;;  %s3234_s25 = scalar_lea.vmem %s5670_s19, 1024 }
  0x1e   : > { %2995 = vmatpush1.bf16.msra.mxu0 %v2994_v22  ;;  %v280_v41 = vld [vmem:[%s3460_s20 + $0x28] sm:$0xff]  ;;  %v3515_v42 = vld [vmem:[%s3446_s13 + $0x18] sm:$0xff]  ;;  %v281_v43 = vld [vmem:[%s3460_s20 + $0x30] sm:$0xff]  ;;  %p3235_p11 = scmp.ne.s32.totalorder %s5670_s19, %s3234_s25 }
  0x1f   : > { %3003 = vmatpush1.bf16.msra.mxu1 %v3002_v27  ;;  %v282_v45 = vld [vmem:[%s3460_s20 + $0x38] sm:$0xff]  ;;  %v1945_v48 = vld [vmem:[%s5721_s5 + $0x180] sm:$0xff]  ;;  %v1946_v50 = vld [vmem:[%s5721_s5 + $0x188] sm:$0xff]  ;;  %3005 = vmatprep.subr.bf16.mxu0 %v3004_v49 }
  0x20   : > { %1384 = vperm.xlu0 %3189, %v3465_v28   ;;  %3183 = vset.pattern.permute.xlu1 %v3301_v31  ;;  %v1897_v51 = vld [vmem:[%s5721_s5] sm:$0xff]  ;;  %v1898_v52 = vld [vmem:[%s5721_s5 + $0x8] sm:$0xff]  ;;  %v3036_v53 = vpack.c.bf16 %v1946_v50, %v1945_v48  ;;  %v1915_v58 = vld [vmem:[%s5721_s5 + $0x90] sm:$0xff]  ;;  %p3236_p12 = pnand %p3235_p11, %p3383_p5 }
  0x21   : > { %653 = vperm.xlu1 %3183, %v3468_v29   ;;  %2486 = vmatmul.mubr.msk.f32.vlgmr.msra.gmra.mrb[0].mxu0 %vm321_vm0, %v275_v30  ;;  %v3006_v54 = vpack.c.bf16 %v1898_v52, %v1897_v51  ;;  %v1929_v55 = vld [vmem:[%s5721_s5 + $0x100] sm:$0xff]  ;;  %v1930_v56 = vld [vmem:[%s5721_s5 + $0x108] sm:$0xff]  ;;  %v1916_v59 = vld [vmem:[%s5721_s5 + $0x98] sm:$0xff] }
  0x22   : > { %2494 = vmatmul.mubr.msk.f32.vlgmr.msra.gmra.mrb[0].mxu1 %vm321_vm0, %v275_v30  ;;  %416 = vmatprep.mubr.f32.mxu0 %v5730_v12  ;;  %v3038_v57 = vpack.c.bf16 %v1930_v56, %v1929_v55  ;;  %v1947_v60 = vld [vmem:[%s5721_s5 + $0x190] sm:$0xff]  ;;  %v3008_v61 = vpack.c.bf16 %v1916_v59, %v1915_v58  ;;  %v1948_v62 = vld [vmem:[%s5721_s5 + $0x198] sm:$0xff]  ;;  %v1917_v8 = vld [vmem:[%s5721_s5 + $0xa0] sm:$0xff]  ;;  %p3237_p13 = pneg %p3236_p12 }
  0x23   : > { %529 = vmatprep.mubr.f32.mxu1 %v5730_v12  ;;  %3037 = vmatprep.subr.bf16.mxu1 %v3036_v53  ;;  %v1899_v63 = vld [vmem:[%s5721_s5 + $0x10] sm:$0xff]  ;;  %v1900_v0 = vld [vmem:[%s5721_s5 + $0x18] sm:$0xff]  ;;  %v3040_v3 = vpack.c.bf16 %v1948_v62, %v1947_v60  ;;  %v1918_v9 = vld [vmem:[%s5721_s5 + $0xa8] sm:$0xff] }
  0x24   : > { %3200 = vset.pattern.permute.xlu0 %v3302_v33  ;;  %3007 = vmatpush3.bf16.msra.mxu0 %v3006_v54  ;;  %v3010_v4 = vpack.c.bf16 %v1900_v0, %v1899_v63  ;;  %v1931_v5 = vld [vmem:[%s5721_s5 + $0x110] sm:$0xff]  ;;  %v1932_v6 = vld [vmem:[%s5721_s5 + $0x118] sm:$0xff]  ;;  %v1949_v10 = vld [vmem:[%s5721_s5 + $0x1a0] sm:$0xff]  ;;  %v3012_v11 = vpack.c.bf16 %v1918_v9, %v1917_v8 }
  0x25   : > { %770 = vperm.xlu0 %3200, %v3455_v26   ;;  %3184 = vset.pattern.permute.xlu1 %v3302_v33  ;;  %v3042_v7 = vpack.c.bf16 %v1932_v6, %v1931_v5  ;;  %v1950_v13 = vld [vmem:[%s5721_s5 + $0x1a8] sm:$0xff]  ;;  %v1901_v14 = vld [vmem:[%s5721_s5 + $0x20] sm:$0xff]  ;;  %v3614_v16 = vld [vmem:[%s3446_s13 + $0x30] sm:$0xff] }
  0x26   : > { %773 = vperm.xlu1 %3184, %v3468_v29   ;;  %2487 = vmatmul.mubr.msk.f32.gmra.mrb[2].mxu0 %vm321_vm0, %v276_v32  ;;  %v1902_v15 = vld [vmem:[%s5721_s5 + $0x28] sm:$0xff]  ;;  %v3044_v17 = vpack.c.bf16 %v1950_v13, %v1949_v10  ;;  %v1933_v19 = vld [vmem:[%s5721_s5 + $0x120] sm:$0xff]  ;;  %v1919_v22 = vld [vmem:[%s5721_s5 + $0xb0] sm:$0xff] }
  0x27   : > { %2495 = vmatmul.mubr.msk.f32.gmra.mrb[2].mxu1 %vm321_vm0, %v276_v32  ;;  %422 = vmatprep.mubr.f32.mxu0 %v5730_v12  ;;  %v3014_v18 = vpack.c.bf16 %v1902_v15, %v1901_v14  ;;  %v1934_v20 = vld [vmem:[%s5721_s5 + $0x128] sm:$0xff]  ;;  %v1920_v23 = vld [vmem:[%s5721_s5 + $0xb8] sm:$0xff]  ;;  %v1951_v24 = vld [vmem:[%s5721_s5 + $0x1b0] sm:$0xff] }
  0x28   : > { %535 = vmatprep.mubr.f32.mxu1 %v5730_v12  ;;  %3039 = vmatpush3.bf16.msra.mxu1 %v3038_v57  ;;  %v3046_v21 = vpack.c.bf16 %v1934_v20, %v1933_v19  ;;  %v3016_v25 = vpack.c.bf16 %v1920_v23, %v1919_v22  ;;  %v1952_v27 = vld [vmem:[%s5721_s5 + $0x1b8] sm:$0xff]  ;;  %v1903_v30 = vld [vmem:[%s5721_s5 + $0x30] sm:$0xff]  ;;  %v1922_v46 = vld [vmem:[%s5721_s5 + $0xc8] sm:$0xff] }
  0x29   : > { %785 = vperm.xlu0 %3200, %v3484_v34   ;;  %3009 = vmatprep.subr.bf16.mxu0 %v3008_v61  ;;  %v1904_v32 = vld [vmem:[%s5721_s5 + $0x38] sm:$0xff]  ;;  %v1953_v47 = vld [vmem:[%s5721_s5 + $0x1c0] sm:$0xff]  ;;  %v1954_v49 = vld [vmem:[%s5721_s5 + $0x1c8] sm:$0xff] }
  0x2a   : > { %3185 = vset.pattern.permute.xlu1 %v3299_v2  ;;  %2488 = vmatmul.mubr.msk.f32.gmra.mrb[4].mxu0 %vm321_vm0, %v277_v35  ;;  %v1905_v50 = vld [vmem:[%s5721_s5 + $0x40] sm:$0xff]  ;;  %v1906_v51 = vld [vmem:[%s5721_s5 + $0x48] sm:$0xff]  ;;  %v3052_v52 = vpack.c.bf16 %v1954_v49, %v1953_v47  ;;  %v3685_v58 = vld [vmem:[%s3446_s13 + $0x38] sm:$0xff] }
  0x2b   : > { %925 = vperm.xlu1 %3185, %v3468_v29   ;;  %2496 = vmatmul.mubr.msk.f32.gmra.mrb[4].mxu1 %vm321_vm0, %v277_v35  ;;  %v3048_v35 = vpack.c.bf16 %v1952_v27, %v1951_v24  ;;  %v3022_v53 = vpack.c.bf16 %v1906_v51, %v1905_v50  ;;  %v1937_v54 = vld [vmem:[%s5721_s5 + $0x140] sm:$0xff]  ;;  %v1938_v55 = vld [vmem:[%s5721_s5 + $0x148] sm:$0xff]  ;;  %v1923_v59 = vld [vmem:[%s5721_s5 + $0xd0] sm:$0xff] }
  0x2c   : > { %428 = vmatprep.mubr.f32.mxu0 %v5730_v12  ;;  %541 = vmatprep.mubr.f32.mxu1 %v5730_v12  ;;  %v3680_v56 = vld [vmem:[%s3446_s13 + $0x20] sm:$0xff]  ;;  %v3054_v57 = vpack.c.bf16 %v1938_v55, %v1937_v54  ;;  %v1924_v60 = vld [vmem:[%s5721_s5 + $0xd8] sm:$0xff]  ;;  %v1955_v61 = vld [vmem:[%s5721_s5 + $0x1d0] sm:$0xff]  ;;  %s3238_s13 = sshll.u32 %s3307_s29, 4  ;;  %s3239_s13 = int_to_ptr.vmem [resolvable:$false] %s3238_s13 }
  0x2d   : > { %3207 = vset.pattern.permute.xlu0 %v5726_v37  ;;  %3041 = vmatprep.subr.bf16.mxu1 %v3040_v3  ;;  %v1956_v62 = vld [vmem:[%s5721_s5 + $0x1d8] sm:$0xff]  ;;  %v1907_v63 = vld [vmem:[%s5721_s5 + $0x50] sm:$0xff]  ;;  %v1925_v8 = vld [vmem:[%s5721_s5 + $0xe0] sm:$0xff]  ;;  %s3240_s10 = scalar_lea.vmem %s3239_s13, 2048  ;;  %p3241_p0 = scmp.lt.s32.totalorder %s5670_s19, %s3239_s13 }
  0x2e   : > { %1688 = vperm.xlu0 %3207, %v3465_v28   ;;  %2489 = vmatmul.mubr.msk.f32.gmra.mrb[6].mxu0 %vm321_vm0, %v278_v36  ;;  %v1908_v0 = vld [vmem:[%s5721_s5 + $0x58] sm:$0xff]  ;;  %v3056_v3 = vpack.c.bf16 %v1956_v62, %v1955_v61  ;;  %v1939_v5 = vld [vmem:[%s5721_s5 + $0x150] sm:$0xff]  ;;  %v1926_v9 = vld [vmem:[%s5721_s5 + $0xe8] sm:$0xff]  ;;  %p3242_p1 = scmp.lt.s32.totalorder %s3240_s10, %s3234_s25 }
  0x2f   : > { %3186 = vset.pattern.permute.xlu1 %v5725_v38  ;;  %2497 = vmatmul.mubr.msk.f32.gmra.mrb[6].mxu1 %vm321_vm0, %v278_v36  ;;  %v3018_v36 = vpack.c.bf16 %v1904_v32, %v1903_v30  ;;  %v1940_v6 = vld [vmem:[%s5721_s5 + $0x158] sm:$0xff]  ;;  %v1957_v10 = vld [vmem:[%s5721_s5 + $0x1e0] sm:$0xff]  ;;  %v1958_v13 = vld [vmem:[%s5721_s5 + $0x1e8] sm:$0xff] }
  0x30   : > { %1226 = vperm.xlu1 %3186, %v3455_v26   ;;  %434 = vmatprep.mubr.f32.mxu0 %v5730_v12  ;;  %v1909_v14 = vld [vmem:[%s5721_s5 + $0x60] sm:$0xff]  ;;  %v1910_v15 = vld [vmem:[%s5721_s5 + $0x68] sm:$0xff]  ;;  %v1927_v22 = vld [vmem:[%s5721_s5 + $0xf0] sm:$0xff]  ;;  %p3243_p2 = por %p3242_p1, %p3241_p0 }
  0x31   : > { %547 = vmatprep.mubr.f32.mxu1 %v5730_v12  ;;  %3011 = vmatpush3.bf16.msra.mxu0 %v3010_v4  ;;  %v3026_v4 = vpack.c.bf16 %v1908_v0, %v1907_v63  ;;  %v1941_v19 = vld [vmem:[%s5721_s5 + $0x160] sm:$0xff]  ;;  %v1942_v20 = vld [vmem:[%s5721_s5 + $0x168] sm:$0xff]  ;;  %v1928_v23 = vld [vmem:[%s5721_s5 + $0xf8] sm:$0xff] }
  0x32   : > { %3208 = vset.pattern.permute.xlu0 %v5729_v40  ;;  %2490 = vmatmul.mubr.msk.f32.gmra.mrb[8].mxu0 %vm321_vm0, %v279_v39  ;;  %v1959_v24 = vld [vmem:[%s5721_s5 + $0x1f0] sm:$0xff]  ;;  %v1960_v27 = vld [vmem:[%s5721_s5 + $0x1f8] sm:$0xff]  ;;  %p3244_p3 = pnand %p3243_p2, %p3237_p13 }
  0x33   : > { %1530 = vperm.xlu0 %3208, %v3455_v26   ;;  %2498 = vmatmul.mubr.msk.f32.gmra.mrb[8].mxu1 %vm321_vm0, %v279_v39  ;;  %v1935_v39 = vld [vmem:[%s5721_s5 + $0x130] sm:$0xff]  ;;  %v1912_v32 = vld [vmem:[%s5721_s5 + $0x78] sm:$0xff] }
  0x34   : > { %3187 = vset.pattern.permute.xlu1 %v3302_v33  ;;  %440 = vmatprep.mubr.f32.mxu0 %v5730_v12  ;;  %v1911_v30 = vld [vmem:[%s5721_s5 + $0x70] sm:$0xff] }
  0x35   : > { %776 = vperm.xlu1 %3187, %v3465_v28   ;;  %553 = vmatprep.mubr.f32.mxu1 %v5730_v12 }
  0x36   : > { %2491 = vmatmul.mubr.msk.f32.gmra.mrb[10].mxu0 %vm321_vm0, %v280_v41  ;;  %3043 = vmatpush3.bf16.msra.mxu1 %v3042_v7  ;;  %v3058_v7 = vpack.c.bf16 %v1940_v6, %v1939_v5 }
  0x37   : > { %1539 = vperm.xlu0 %3208, %v3515_v42   ;;  %2499 = vmatmul.mubr.msk.f32.gmra.mrb[10].mxu1 %vm321_vm0, %v280_v41  ;;  %v1936_v41 = vld [vmem:[%s5721_s5 + $0x138] sm:$0xff] }
  0x38   : > { %446 = vmatprep.mubr.f32.mxu0 %v5730_v12  ;;  %559 = vmatprep.mubr.f32.mxu1 %v5730_v12 }
  0x39   : > { %3188 = vset.pattern.permute.xlu1 %v5728_v44  ;;  %3013 = vmatprep.subr.bf16.mxu0 %v3012_v11  ;;  %v3028_v11 = vpack.c.bf16 %v1926_v9, %v1925_v8 }
  0x3a   : > { %1077 = vperm.xlu1 %3188, %v3468_v29   ;;  %2492 = vmatmul.mubr.msk.f32.gmra.mrb[12].mxu0 %vm321_vm0, %v281_v43 }
  0x3b   : > { %3211 = vset.pattern.permute.xlu0 %v5728_v44  ;;  %2500 = vmatmul.mubr.msk.f32.gmra.mrb[12].mxu1 %vm321_vm0, %v281_v43  ;;  %v3050_v43 = vpack.c.bf16 %v1936_v41, %v1935_v39  ;;  %v1943_v39 = vld [vmem:[%s5721_s5 + $0x170] sm:$0xff]  ;;  %v1944_v41 = vld [vmem:[%s5721_s5 + $0x178] sm:$0xff] }
  0x3c   : > { %1074 = vperm.xlu0 %3211, %v3455_v26   ;;  %452 = vmatprep.mubr.f32.mxu0 %v5730_v12 }
  0x3d   : > { %565 = vmatprep.mubr.f32.mxu1 %v5730_v12  ;;  %3045 = vmatprep.subr.bf16.mxu1 %v3044_v17  ;;  %v3060_v17 = vpack.c.bf16 %v1958_v13, %v1957_v10 }
  0x3e   : > { %3190 = vset.pattern.permute.xlu1 %v3299_v2  ;;  %2493 = vmatmul.mubr.msk.f32.gmra.mrb[14].mxu0 %vm321_vm0, %v282_v45 }
  0x3f   : > { %928 = vperm.xlu1 %3190, %v3465_v28   ;;  %2501 = vmatmul.mubr.msk.f32.gmra.mrb[14].mxu1 %vm321_vm0, %v282_v45  ;;  %v1921_v45 = vld [vmem:[%s5721_s5 + $0xc0] sm:$0xff] }
  0x40   : > { %1080 = vperm.xlu0 %3211, %v3465_v28   ;;  %3015 = vmatpush3.bf16.msra.mxu0 %v3014_v18  ;;  %v3020_v48 = vpack.c.bf16 %v1922_v46, %v1921_v45  ;;  %v3030_v18 = vpack.c.bf16 %v1910_v15, %v1909_v14 }
  0x41   : > { %3047 = vmatpush3.bf16.msra.mxu1 %v3046_v21  ;;  %3017 = vmatprep.subr.bf16.mxu0 %v3016_v25  ;;  %v3062_v21 = vpack.c.bf16 %v1942_v20, %v1941_v19  ;;  %v3032_v25 = vpack.c.bf16 %v1928_v23, %v1927_v22 }
  0x42   : > { %3049 = vmatprep.subr.bf16.mxu1 %v3048_v35  ;;  %v3064_v35 = vpack.c.bf16 %v1960_v27, %v1959_v24 }
  0x43   : > { %3191 = vset.pattern.permute.xlu1 %v5725_v38 }
  0x44   : > { %1089 = vperm.xlu0 %3211, %v3484_v34   ;;  %1229 = vperm.xlu1 %3191, %v3468_v29  }
  0x45   : > { %3019 = vmatpush3.bf16.msra.mxu0 %v3018_v36  ;;  %3051 = vmatpush3.bf16.msra.mxu1 %v3050_v43  ;;  %v3034_v36 = vpack.c.bf16 %v1912_v32, %v1911_v30  ;;  %v3066_v43 = vpack.c.bf16 %v1944_v41, %v1943_v39 }
  0x46   : > { %3021 = vmatprep.subr.bf16.mxu0 %v3020_v48  ;;  %3053 = vmatprep.subr.bf16.mxu1 %v3052_v52 }
  0x48   : > { %3214 = vset.pattern.permute.xlu0 %v3299_v2  ;;  %3192 = vset.pattern.permute.xlu1 %v3301_v31 }
  0x49   : > { %931 = vperm.xlu0 %3214, %v3515_v42   ;;  %659 = vperm.xlu1 %3192, %v3515_v42  }
  0x4a   : > { %3023 = vmatpush3.bf16.msra.mxu0 %v3022_v53  ;;  %3055 = vmatpush3.bf16.msra.mxu1 %v3054_v57 }
  0x4b   : > { %3057 = vmatprep.subr.bf16.mxu1 %v3056_v3 }
  0x4d   : > { %940 = vperm.xlu0 %3214, %v3614_v16   ;;  %3193 = vset.pattern.permute.xlu1 %v3302_v33 }
  0x4e   : > { %779 = vperm.xlu1 %3193, %v3515_v42   ;;  %3059 = vmatpush3.bf16.msra.mxu1 %v3058_v7 }
  0x4f   : > { %3061 = vmatprep.subr.bf16.mxu1 %v3060_v17 }
  0x51   : > { %3217 = vset.pattern.permute.xlu0 %v3301_v31 }
  0x52   : > { %650 = vperm.xlu0 %3217, %v3455_v26   ;;  %3194 = vset.pattern.permute.xlu1 %v5724_v1 }
  0x53   : > { %1381 = vperm.xlu1 %3194, %v3468_v29   ;;  %3063 = vmatpush3.bf16.msra.mxu1 %v3062_v21 }
  0x54   : > { %3065 = vmatprep.subr.bf16.mxu1 %v3064_v35 }
  0x56   : > { %656 = vperm.xlu0 %3217, %v3465_v28  }
  0x57   : > { %3195 = vset.pattern.permute.xlu1 %v5726_v37  ;;  %3067 = vmatpush3.bf16.msra.mxu1 %v3066_v43 }
  0x58   : > { %1682 = vperm.xlu1 %3195, %v3455_v26   ;;  %v3024_v26 = vpack.c.bf16 %v1924_v60, %v1923_v59 }
  0x5a   : > { %662 = vperm.xlu0 %3217, %v3680_v56   ;;  %3025 = vmatprep.subr.bf16.mxu0 %v3024_v26 }
  0x5b   : > { %3027 = vmatpush3.bf16.msra.mxu0 %v3026_v4 }
  0x5c   : > { %3196 = vset.pattern.permute.xlu1 %v5725_v38  ;;  %3029 = vmatprep.subr.bf16.mxu0 %v3028_v11 }
  0x5d   : > { %1232 = vperm.xlu1 %3196, %v3465_v28  }
  0x5e   : > { %671 = vperm.xlu0 %3217, %v3685_v58  }
  0x5f   : > { %3031 = vmatpush3.bf16.msra.mxu0 %v3030_v18 }
  0x60   : > { %3033 = vmatprep.subr.bf16.mxu0 %v3032_v25 }
  0x61   : > { %3197 = vset.pattern.permute.xlu1 %v5729_v40 }
  0x62   : > { %1533 = vperm.xlu1 %3197, %v3468_v29   ;;  %3220 = vset.pattern.permute.xlu0 %v5725_v38 }
  0x63   : > { %1235 = vperm.xlu0 %3220, %v3515_v42   ;;  %3035 = vmatpush3.bf16.msra.mxu0 %v3034_v36 }
  0x66   : > { %3198 = vset.pattern.permute.xlu1 %v3302_v33 }
  0x67   : > { %782 = vperm.xlu1 %3198, %v3680_v56   ;;  %1244 = vperm.xlu0 %3220, %v3614_v16  }
  0x6b   : > { %3199 = vset.pattern.permute.xlu1 %v5728_v44  ;;  %3225 = vset.pattern.permute.xlu0 %v5724_v1 }
  0x6c   : > { %1083 = vperm.xlu1 %3199, %v3515_v42   ;;  %1393 = vperm.xlu0 %3225, %v3484_v34  }
  0x70   : > { %3201 = vset.pattern.permute.xlu1 %v5726_v37  ;;  %1396 = vperm.xlu0 %3225, %v3614_v16  }
  0x71   : > { %1685 = vperm.xlu1 %3201, %v3468_v29  }
  0x74   : > { %3230 = vset.pattern.permute.xlu0 %v5729_v40 }
  0x75   : > { %3202 = vset.pattern.permute.xlu1 %v3299_v2  ;;  %1548 = vperm.xlu0 %3230, %v3614_v16  }
  0x76   : > { %934 = vperm.xlu1 %3202, %v3680_v56  }
  0x79   : > { %1551 = vperm.xlu0 %3230, %v3685_v58  }
  0x7a   : > { %3203 = vset.pattern.permute.xlu1 %v5729_v40 }
  0x7b   : > { %1536 = vperm.xlu1 %3203, %v3465_v28   ;;  %v5723_v28 = vlaneseq }
  0x7d   : > { %3233 = vset.pattern.permute.xlu0 %v5726_v37  ;;  %v3798_v46 = vand.u32 127, %v5723_v28 }
  0x7f   : > { %3204 = vset.pattern.permute.xlu1 %v3301_v31  ;;  %v3802_v49 = vadd.s32 128, %v3798_v46  ;;  %v3809_v50 = vadd.s32 384, %v3798_v46 }
  0x80   : > { %665 = vperm.xlu1 %3204, %v3484_v34  }
  0x84   : > { %3205 = vset.pattern.permute.xlu1 %v5728_v44 }
  0x85   : > { %1086 = vperm.xlu1 %3205, %v3680_v56  }
  0x89   : > { %3206 = vset.pattern.permute.xlu1 %v5724_v1 }
  0x8a   : > { %1387 = vperm.xlu1 %3206, %v3515_v42  }
  0x8e   : > { %3209 = vset.pattern.permute.xlu1 %v3299_v2 }
  0x8f   : > { %937 = vperm.xlu1 %3209, %v3484_v34  }
  0x93   : > { %3210 = vset.pattern.permute.xlu1 %v5725_v38 }
  0x94   : > { %1238 = vperm.xlu1 %3210, %v3680_v56  }
  0x98   : > { %3212 = vset.pattern.permute.xlu1 %v3301_v31  ;;  %v3806_v31 = vadd.s32 256, %v3798_v46 }
  0x99   : > { %668 = vperm.xlu1 %3212, %v3614_v16  }
  0x9b   : > { %v923_v29 = vpop.permute.xlu1 %922  ;;  %v1379_v45 = vpop.permute.xlu0 %1378 }
  0x9c   : > { %vm945_vm1 = vcmp.eq.s32.totalorder %v923_v29, %v3798_v46  ;;  %vm946_vm2 = vcmp.eq.s32.totalorder %v923_v29, %v3802_v49  ;;  %vm947_vm3 = vcmp.eq.s32.totalorder %v923_v29, %v3806_v31  ;;  %vm948_vm4 = vcmp.eq.s32.totalorder %v923_v29, %v3809_v50 }
  0x9d   : > { %3213 = vset.pattern.permute.xlu1 %v3302_v33  ;;  %vm1401_vm5 = vcmp.eq.s32.totalorder %v1379_v45, %v3798_v46  ;;  %vm1402_vm6 = vcmp.eq.s32.totalorder %v1379_v45, %v3802_v49  ;;  %vm1403_vm7 = vcmp.eq.s32.totalorder %v1379_v45, %v3806_v31  ;;  %vm1404_vm8 = vcmp.eq.s32.totalorder %v1379_v45, %v3809_v50 }
  0x9e   : > { %788 = vperm.xlu1 %3213, %v3614_v16   ;;  %v3827_v54 = vsel %vm945_vm1, 1.0, %v5730_v12  ;;  %v3830_v55 = vsel %vm946_vm2, 1.0, %v5730_v12  ;;  %v3833_v57 = vsel %vm947_vm3, 1.0, %v5730_v12  ;;  %v3836_v59 = vsel %vm948_vm4, 1.0, %v5730_v12 }
  0x9f   : > { %v1385_v47 = vpop.permute.xlu0 %1384  ;;  %v3839_v60 = vsel %vm1401_vm5, 1.0, %v5730_v12  ;;  %v3842_v61 = vsel %vm1402_vm6, 1.0, %v5730_v12  ;;  %v3847_v26 = vsel %vm1403_vm7, 1.0, %v5730_v12  ;;  %v3850_v62 = vsel %vm1404_vm8, 1.0, %v5730_v12 }
  0xa0   : > { %v654_v48 = vpop.permute.xlu1 %653  ;;  %vm1409_vm13 = vcmp.eq.s32.totalorder %v1385_v47, %v3798_v46  ;;  %vm1410_vm14 = vcmp.eq.s32.totalorder %v1385_v47, %v3802_v49  ;;  %vm1411_vm15 = vcmp.eq.s32.totalorder %v1385_v47, %v3806_v31  ;;  %vm1412_vm0 = vcmp.eq.s32.totalorder %v1385_v47, %v3809_v50 }
  0xa1   : > { %vm677_vm9 = vcmp.eq.s32.totalorder %v654_v48, %v3798_v46  ;;  %vm678_vm10 = vcmp.eq.s32.totalorder %v654_v48, %v3802_v49  ;;  %vm679_vm11 = vcmp.eq.s32.totalorder %v654_v48, %v3806_v31  ;;  %vm680_vm12 = vcmp.eq.s32.totalorder %v654_v48, %v3809_v50 }
  0xa2   : > { %3215 = vset.pattern.permute.xlu1 %v5724_v1  ;;  %v2506_v0 = vsel %vm677_vm9, 1.0, %v5730_v12  ;;  %v2507_v3 = vsel %vm678_vm10, 1.0, %v5730_v12  ;;  %v2508_v4 = vsel %vm679_vm11, 1.0, %v5730_v12  ;;  %v2509_v5 = vsel %vm680_vm12, 1.0, %v5730_v12 }
  0xa3   : > { %1390 = vperm.xlu1 %3215, %v3680_v56   ;;  %v3871_v6 = vsel %vm1409_vm13, 1.0, %v5730_v12  ;;  %v3874_v7 = vsel %vm1410_vm14, 1.0, %v5730_v12  ;;  %v3879_v9 = vsel %vm1411_vm15, 1.0, %v5730_v12  ;;  %v3882_v10 = vsel %vm1412_vm0, 1.0, %v5730_v12 }
  0xa4   : > { %v3812_v51 = vpop.permute.xlu0 %770  ;;  %5734 = vst [vmem:[#allocation5_spill] sm:$0xff] %v3871_v6  ;;  %5735 = vst [vmem:[#allocation6_spill] sm:$0xff] %v3874_v7  ;;  %v5752_v7 = vmov 3  }
  0xa5   : > { %v774_v52 = vpop.permute.xlu1 %773  ;;  %5736 = vst [vmem:[#allocation7_spill] sm:$0xff] %v3879_v9  ;;  %5737 = vst [vmem:[#allocation8_spill] sm:$0xff] %v3882_v10  ;;  %vm793_vm7 = vcmp.eq.s32.totalorder %v3812_v51, %v3798_v46  ;;  %vm794_vm8 = vcmp.eq.s32.totalorder %v3812_v51, %v3802_v49  ;;  %vm795_vm11 = vcmp.eq.s32.totalorder %v3812_v51, %v3806_v31 }
  0xa6   : > { %vm797_vm1 = vcmp.eq.s32.totalorder %v774_v52, %v3798_v46  ;;  %vm798_vm2 = vcmp.eq.s32.totalorder %v774_v52, %v3802_v49  ;;  %vm799_vm3 = vcmp.eq.s32.totalorder %v774_v52, %v3806_v31  ;;  %vm800_vm4 = vcmp.eq.s32.totalorder %v774_v52, %v3809_v50 }
  0xa7   : > { %3216 = vset.pattern.permute.xlu1 %v5726_v37  ;;  %v2538_v11 = vsel %vm797_vm1, 1.0, %v5730_v12  ;;  %v2539_v13 = vsel %vm798_vm2, 1.0, %v5730_v12  ;;  %v2540_v14 = vsel %vm799_vm3, 1.0, %v5730_v12  ;;  %v2541_v15 = vsel %vm800_vm4, 1.0, %v5730_v12 }
  0xa8   : > { %1691 = vperm.xlu1 %3216, %v3515_v42   ;;  %v3824_v53 = vpop.permute.xlu0 %785  ;;  %v893_v18 = vadd.f32 %v2538_v11, %v2506_v0  ;;  %v894_v19 = vadd.f32 %v2539_v13, %v2507_v3  ;;  %vm796_vm12 = vcmp.eq.s32.totalorder %v3812_v51, %v3809_v50  ;;  %v895_v20 = vadd.f32 %v2540_v14, %v2508_v4 }
  0xa9   : > { %v896_v21 = vadd.f32 %v2541_v15, %v2509_v5  ;;  %v3907_v25 = vsel %vm793_vm7, 1.0, %v5730_v12  ;;  %vm813_vm13 = vcmp.eq.s32.totalorder %v3824_v53, %v3798_v46  ;;  %v3917_v32 = vsel %vm794_vm8, 1.0, %v5730_v12 }
  0xaa   : > { %v926_v42 = vpop.permute.xlu1 %925  ;;  %vm814_vm14 = vcmp.eq.s32.totalorder %v3824_v53, %v3802_v49  ;;  %vm815_vm15 = vcmp.eq.s32.totalorder %v3824_v53, %v3806_v31  ;;  %vm816_vm0 = vcmp.eq.s32.totalorder %v3824_v53, %v3809_v50  ;;  %v3932_v36 = vsel %vm795_vm11, 1.0, %v5730_v12 }
  0xab   : > { %vm949_vm5 = vcmp.eq.s32.totalorder %v926_v42, %v3798_v46  ;;  %vm950_vm6 = vcmp.eq.s32.totalorder %v926_v42, %v3802_v49  ;;  %vm951_vm9 = vcmp.eq.s32.totalorder %v926_v42, %v3806_v31  ;;  %vm952_vm10 = vcmp.eq.s32.totalorder %v926_v42, %v3809_v50 }
  0xac   : > { %3218 = vset.pattern.permute.xlu1 %v5725_v38  ;;  %v2570_v22 = vsel %vm949_vm5, 1.0, %v5730_v12  ;;  %v2571_v23 = vsel %vm950_vm6, 1.0, %v5730_v12  ;;  %v2572_v27 = vsel %vm951_vm9, 1.0, %v5730_v12  ;;  %v2573_v30 = vsel %vm952_vm10, 1.0, %v5730_v12 }
  0xad   : > { %1241 = vperm.xlu1 %3218, %v3484_v34   ;;  %v3862_v63 = vpop.permute.xlu0 %1688  ;;  %v3938_v39 = vsel %vm796_vm12, 1.0, %v5730_v12  ;;  %v3940_v41 = vadd.f32 %v2570_v22, %v893_v18  ;;  %v3942_v43 = vadd.f32 %v2571_v23, %v894_v19  ;;  %v3947_v29 = vadd.f32 %v2573_v30, %v896_v21 }
  0xae   : > { %v3950_v45 = vsel %vm813_vm13, 1.0, %v5730_v12  ;;  %v3955_v47 = vsel %vm814_vm14, 1.0, %v5730_v12  ;;  %v3958_v48 = vsel %vm815_vm15, 1.0, %v5730_v12  ;;  %v3961_v51 = vsel %vm816_vm0, 1.0, %v5730_v12 }
  0xaf   : > { %v3876_v8 = vpop.permute.xlu1 %1226  ;;  %5738 = vst [vmem:[#allocation9_spill] sm:$0xff] %v3950_v45  ;;  %5739 = vst [vmem:[#allocation10_spill] sm:$0xff] %v3955_v47  ;;  %vm1714_vm5 = vcmp.eq.s32.totalorder %v3862_v63, %v3802_v49  ;;  %vm1716_vm6 = vcmp.eq.s32.totalorder %v3862_v63, %v3809_v50  ;;  %vm1713_vm7 = vcmp.eq.s32.totalorder %v3862_v63, %v3798_v46 }
  0xb0   : > { %vm1249_vm1 = vcmp.eq.s32.totalorder %v3876_v8, %v3798_v46  ;;  %5740 = vst [vmem:[#allocation11_spill] sm:$0xff] %v3958_v48  ;;  %5741 = vst [vmem:[#allocation12_spill] sm:$0xff] %v3961_v51  ;;  %vm1250_vm2 = vcmp.eq.s32.totalorder %v3876_v8, %v3802_v49  ;;  %vm1251_vm3 = vcmp.eq.s32.totalorder %v3876_v8, %v3806_v31  ;;  %v3998_v5 = vsel %vm1714_vm5, 1.0, %v5730_v12 }
  0xb1   : > { %3219 = vset.pattern.permute.xlu1 %v5729_v40  ;;  %vm1252_vm4 = vcmp.eq.s32.totalorder %v3876_v8, %v3809_v50  ;;  %v3974_v53 = vsel %vm1249_vm1, 1.0, %v5730_v12  ;;  %vm1715_vm8 = vcmp.eq.s32.totalorder %v3862_v63, %v3806_v31  ;;  %v3985_v0 = vsel %vm1250_vm2, 1.0, %v5730_v12  ;;  %5742 = vst [vmem:[#allocation13_spill] sm:$0xff] %v3998_v5 }
  0xb2   : > { %1542 = vperm.xlu1 %3219, %v3680_v56   ;;  %v1531_v17 = vpop.permute.xlu0 %1530  ;;  %v3992_v3 = vsel %vm1251_vm3, 1.0, %v5730_v12  ;;  %v3995_v4 = vsel %vm1252_vm4, 1.0, %v5730_v12  ;;  %v4001_v8 = vsel %vm1716_vm6, 1.0, %v5730_v12  ;;  %v4014_v14 = vsel %vm1713_vm7, 1.0, %v5730_v12 }
  0xb3   : > { %vm1553_vm9 = vcmp.eq.s32.totalorder %v1531_v17, %v3798_v46  ;;  %vm1554_vm10 = vcmp.eq.s32.totalorder %v1531_v17, %v3802_v49  ;;  %vm1555_vm11 = vcmp.eq.s32.totalorder %v1531_v17, %v3806_v31  ;;  %vm1556_vm12 = vcmp.eq.s32.totalorder %v1531_v17, %v3809_v50  ;;  %5743 = vst [vmem:[#allocation14_spill] sm:$0xff] %v4001_v8 }
  0xb4   : > { %v3904_v24 = vpop.permute.xlu1 %776  ;;  %v4006_v11 = vsel %vm1553_vm9, 1.0, %v5730_v12  ;;  %5744 = vst [vmem:[#allocation15_spill] sm:$0xff] %v4014_v14  ;;  %v4020_v15 = vsel %vm1715_vm8, 1.0, %v5730_v12  ;;  %v4025_v17 = vsel %vm1554_vm10, 1.0, %v5730_v12  ;;  %v4028_v18 = vsel %vm1555_vm11, 1.0, %v5730_v12 }
  0xb5   : > { %vm801_vm13 = vcmp.eq.s32.totalorder %v3904_v24, %v3798_v46  ;;  %5745 = vst [vmem:[#allocation16_spill] sm:$0xff] %v4020_v15  ;;  %vm802_vm14 = vcmp.eq.s32.totalorder %v3904_v24, %v3802_v49  ;;  %v4031_v19 = vsel %vm1556_vm12, 1.0, %v5730_v12  ;;  %vm803_vm15 = vcmp.eq.s32.totalorder %v3904_v24, %v3806_v31 }
  0xb6   : > { %3221 = vset.pattern.permute.xlu1 %v3302_v33  ;;  %v3926_v35 = vpop.permute.xlu0 %1539  ;;  %v3945_v33 = vadd.f32 %v2572_v27, %v895_v20  ;;  %vm804_vm0 = vcmp.eq.s32.totalorder %v3904_v24, %v3809_v50  ;;  %v4043_v63 = vsel %vm801_vm13, 1.0, %v5730_v12  ;;  %v4051_v21 = vsel %vm802_vm14, 1.0, %v5730_v12 }
  0xb7   : > { %791 = vperm.xlu1 %3221, %v3685_v58   ;;  %vm1565_vm3 = vcmp.eq.s32.totalorder %v3926_v35, %v3798_v46  ;;  %vm1566_vm6 = vcmp.eq.s32.totalorder %v3926_v35, %v3802_v49  ;;  %vm1567_vm7 = vcmp.eq.s32.totalorder %v3926_v35, %v3806_v31  ;;  %vm1568_vm8 = vcmp.eq.s32.totalorder %v3926_v35, %v3809_v50 }
  0xb8   : > { %v4060_v22 = vsel %vm803_vm15, 1.0, %v5730_v12  ;;  %v4063_v23 = vsel %vm804_vm0, 1.0, %v5730_v12  ;;  %v4077_v1 = vsel %vm1566_vm6, 1.0, %v5730_v12  ;;  %v4080_v38 = vsel %vm1567_vm7, 1.0, %v5730_v12 }
  0xb9   : > { %v1078_v52 = vpop.permute.xlu1 %1077  ;;  %5747 = vst [vmem:[#allocation18_spill] sm:$0xff] %v4077_v1  ;;  %5748 = vst [vmem:[#allocation19_spill] sm:$0xff] %v4080_v38 }
  0xba   : > { %vm1101_vm1 = vcmp.eq.s32.totalorder %v1078_v52, %v3798_v46  ;;  %vm1102_vm2 = vcmp.eq.s32.totalorder %v1078_v52, %v3802_v49  ;;  %vm1103_vm4 = vcmp.eq.s32.totalorder %v1078_v52, %v3806_v31  ;;  %vm1104_vm5 = vcmp.eq.s32.totalorder %v1078_v52, %v3809_v50 }
  0xbb   : > { %3222 = vset.pattern.permute.xlu1 %v5728_v44  ;;  %v3982_v42 = vpop.permute.xlu0 %1074  ;;  %v2603_v24 = vsel %vm1102_vm2, 1.0, %v5730_v12  ;;  %v4070_v52 = vsel %vm1565_vm3, 1.0, %v5730_v12  ;;  %v2604_v28 = vsel %vm1103_vm4, 1.0, %v5730_v12  ;;  %v2605_v35 = vsel %vm1104_vm5, 1.0, %v5730_v12 }
  0xbc   : > { %1092 = vperm.xlu1 %3222, %v3614_v16   ;;  %5746 = vst [vmem:[#allocation17_spill] sm:$0xff] %v4070_v52  ;;  %vm1097_vm9 = vcmp.eq.s32.totalorder %v3982_v42, %v3798_v46  ;;  %vm1098_vm10 = vcmp.eq.s32.totalorder %v3982_v42, %v3802_v49  ;;  %v1198_v40 = vadd.f32 %v2603_v24, %v3942_v43  ;;  %v5750_v52 = vmov 0.0  }
  0xbd   : > { %vm1099_vm11 = vcmp.eq.s32.totalorder %v3982_v42, %v3806_v31  ;;  %vm1100_vm12 = vcmp.eq.s32.totalorder %v3982_v42, %v3809_v50  ;;  %v1200_v38 = vadd.f32 %v2605_v35, %v3947_v29  ;;  %v5751_v42 = vmov 6  }
  0xbe   : > { %v4008_v13 = vpop.permute.xlu1 %928  ;;  %v4116_v43 = vsel %vm1099_vm11, 1.0, %v5750_v52 }
  0xbf   : > { %v4033_v20 = vpop.permute.xlu0 %1080  ;;  %vm953_vm13 = vcmp.eq.s32.totalorder %v4008_v13, %v3798_v46  ;;  %vm954_vm14 = vcmp.eq.s32.totalorder %v4008_v13, %v3802_v49  ;;  %vm955_vm15 = vcmp.eq.s32.totalorder %v4008_v13, %v3806_v31  ;;  %vm956_vm0 = vcmp.eq.s32.totalorder %v4008_v13, %v3809_v50 }
  0xc0   : > { %3223 = vset.pattern.permute.xlu1 %v5726_v37  ;;  %v4083_v37 = vsel %vm1568_vm8, 1.0, %v5730_v12  ;;  %v4124_v29 = vsel %vm953_vm13, 1.0, %v5750_v52  ;;  %vm1105_vm3 = vcmp.eq.s32.totalorder %v4033_v20, %v3798_v46  ;;  %v4132_v13 = vsel %vm954_vm14, 1.0, %v5750_v52 }
  0xc1   : > { %1694 = vperm.xlu1 %3223, %v3680_v56   ;;  %v2602_v56 = vsel %vm1101_vm1, 1.0, %v5730_v12  ;;  %5749 = vst [vmem:[#allocation20_spill] sm:$0xff] %v4083_v37  ;;  %v1199_v12 = vadd.f32 %v2604_v28, %v3945_v33  ;;  %v4098_v37 = vsel %vm1097_vm9, 1.0, %v5750_v52  ;;  %v4119_v33 = vsel %vm1100_vm12, 1.0, %v5750_v52 }
  0xc2   : > { %v1197_v44 = vadd.f32 %v2602_v56, %v3940_v41  ;;  %v4135_v56 = vsel %vm955_vm15, 1.0, %v5750_v52  ;;  %v4138_v24 = vsel %vm956_vm0, 1.0, %v5750_v52  ;;  %vm1106_vm6 = vcmp.eq.s32.totalorder %v4033_v20, %v3802_v49 }
  0xc3   : > { %v1230_v27 = vpop.permute.xlu1 %1229  ;;  %v4067_v30 = vpop.permute.xlu0 %1089  ;;  %vm1107_vm7 = vcmp.eq.s32.totalorder %v4033_v20, %v3806_v31  ;;  %vm1108_vm8 = vcmp.eq.s32.totalorder %v4033_v20, %v3809_v50  ;;  %v4152_v1 = vsel %vm1105_vm3, 1.0, %v5750_v52  ;;  %v4161_v20 = vsel %vm1106_vm6, 1.0, %v5750_v52 }
  0xc4   : > { %vm1253_vm1 = vcmp.eq.s32.totalorder %v1230_v27, %v3798_v46  ;;  %vm1254_vm2 = vcmp.eq.s32.totalorder %v1230_v27, %v3802_v49  ;;  %vm1255_vm4 = vcmp.eq.s32.totalorder %v1230_v27, %v3806_v31  ;;  %vm1256_vm5 = vcmp.eq.s32.totalorder %v1230_v27, %v3809_v50 }
  0xc5   : > { %3224 = vset.pattern.permute.xlu1 %v3299_v2  ;;  %v4103_v2 = vsel %vm1098_vm10, 1.0, %v5750_v52  ;;  %v2634_v27 = vsel %vm1253_vm1, 1.0, %v5750_v52  ;;  %v2635_v35 = vsel %vm1254_vm2, 1.0, %v5750_v52  ;;  %v2636_v15 = vsel %vm1255_vm4, 1.0, %v5750_v52 }
  0xc6   : > { %943 = vperm.xlu1 %3224, %v3685_v58   ;;  %v2637_v14 = vsel %vm1256_vm5, 1.0, %v5750_v52  ;;  %vm1117_vm9 = vcmp.eq.s32.totalorder %v4067_v30, %v3798_v46  ;;  %vm1118_vm10 = vcmp.eq.s32.totalorder %v4067_v30, %v3802_v49  ;;  %vm1119_vm11 = vcmp.eq.s32.totalorder %v4067_v30, %v3806_v31 }
  0xc7   : > { %vm1120_vm12 = vcmp.eq.s32.totalorder %v4067_v30, %v3809_v50  ;;  %v4170_v5 = vsel %vm1107_vm7, 1.0, %v5750_v52  ;;  %v4173_v9 = vsel %vm1108_vm8, 1.0, %v5750_v52  ;;  %v4175_v6 = vadd.f32 %v2634_v27, %v1197_v44 }
  0xc8   : > { %v4111_v28 = vpop.permute.xlu1 %659  ;;  %v4113_v41 = vpop.permute.xlu0 %931  ;;  %v4177_v10 = vadd.f32 %v2635_v35, %v1198_v40  ;;  %v4180_v51 = vadd.f32 %v2636_v15, %v1199_v12  ;;  %v4182_v48 = vadd.f32 %v2637_v14, %v1200_v38  ;;  %v4185_v47 = vsel %vm1117_vm9, 1.0, %v5750_v52 }
  0xc9   : > { %5755 = vst [vmem:[#allocation23_spill] sm:$0xff] %v4185_v47  ;;  %vm685_vm13 = vcmp.eq.s32.totalorder %v4111_v28, %v3798_v46  ;;  %v4191_v30 = vsel %vm1118_vm10, 1.0, %v5750_v52  ;;  %v4194_v40 = vsel %vm1119_vm11, 1.0, %v5750_v52  ;;  %v4197_v44 = vsel %vm1120_vm12, 1.0, %v5750_v52 }
  0xca   : > { %3226 = vset.pattern.permute.xlu1 %v5751_v42  ;;  %5753 = vst [vmem:[#allocation21_spill] sm:$0xff] %v4180_v51  ;;  %5754 = vst [vmem:[#allocation22_spill] sm:$0xff] %v4182_v48  ;;  %vm686_vm14 = vcmp.eq.s32.totalorder %v4111_v28, %v3802_v49  ;;  %vm687_vm15 = vcmp.eq.s32.totalorder %v4111_v28, %v3806_v31  ;;  %vm688_vm0 = vcmp.eq.s32.totalorder %v4111_v28, %v3809_v50 }
  0xcb   : > { %1545 = vperm.xlu1 %3226, %v3484_v34   ;;  %5756 = vst [vmem:[#allocation24_spill] sm:$0xff] %v4191_v30  ;;  %5757 = vst [vmem:[#allocation25_spill] sm:$0xff] %v4194_v40  ;;  %vm957_vm3 = vcmp.eq.s32.totalorder %v4113_v41, %v3798_v46  ;;  %v2515_v27 = vsel %vm686_vm14, 1.0, %v5750_v52  ;;  %vm958_vm4 = vcmp.eq.s32.totalorder %v4113_v41, %v3802_v49  ;;  %v2516_v40 = vsel %vm687_vm15, 1.0, %v5750_v52 }
  0xcc   : > { %v4149_v42 = vpop.permute.xlu0 %940  ;;  %5758 = vst [vmem:[#allocation26_spill] sm:$0xff] %v4197_v44  ;;  %v5759_v44 = vmov 7   ;;  %vm959_vm6 = vcmp.eq.s32.totalorder %v4113_v41, %v3806_v31  ;;  %vm960_vm7 = vcmp.eq.s32.totalorder %v4113_v41, %v3809_v50  ;;  %v2517_v47 = vsel %vm688_vm0, 1.0, %v5750_v52 }
  0xcd   : > { %v4158_v8 = vpop.permute.xlu1 %779  ;;  %vm969_vm8 = vcmp.eq.s32.totalorder %v4149_v42, %v3798_v46  ;;  %vm970_vm10 = vcmp.eq.s32.totalorder %v4149_v42, %v3802_v49  ;;  %v4250_v45 = vsel %vm960_vm7, 1.0, %v5750_v52 }
  0xce   : > { %5763 = vst [vmem:[#allocation30_spill] sm:$0xff] %v4250_v45  ;;  %vm805_vm11 = vcmp.eq.s32.totalorder %v4158_v8, %v3798_v46  ;;  %vm806_vm12 = vcmp.eq.s32.totalorder %v4158_v8, %v3802_v49  ;;  %v4265_v45 = vsel %vm970_vm10, 1.0, %v5750_v52  ;;  %vm807_vm14 = vcmp.eq.s32.totalorder %v4158_v8, %v3806_v31 }
  0xcf   : > { %3227 = vset.pattern.permute.xlu1 %v5752_v7  ;;  %v2514_v7 = vsel %vm685_vm13, 1.0, %v5750_v52  ;;  %vm971_vm13 = vcmp.eq.s32.totalorder %v4149_v42, %v3806_v31  ;;  %5766 = vst [vmem:[#allocation32_spill] sm:$0xff] %v4265_v45  ;;  %vm808_vm0 = vcmp.eq.s32.totalorder %v4158_v8, %v3809_v50  ;;  %vm972_vm10 = vcmp.eq.s32.totalorder %v4149_v42, %v3809_v50 }
  0xd0   : > { %1095 = vperm.xlu1 %3227, %v3685_v58   ;;  %v4287_v8 = vsel %vm971_vm13, 1.0, %v5750_v52 }
  0xd1   : > { %v651_v12 = vpop.permute.xlu0 %650  ;;  %5767 = vst [vmem:[#allocation33_spill] sm:$0xff] %v4287_v8 }
  0xd2   : > { %vm673_vm1 = vcmp.eq.s32.totalorder %v651_v12, %v3798_v46  ;;  %vm675_vm2 = vcmp.eq.s32.totalorder %v651_v12, %v3806_v31  ;;  %v4207_v38 = vpop.permute.xlu1 %1381  ;;  %vm674_vm5 = vcmp.eq.s32.totalorder %v651_v12, %v3802_v49  ;;  %vm676_vm9 = vcmp.eq.s32.totalorder %v651_v12, %v3809_v50 }
  0xd3   : > { %v2502_v14 = vsel %vm673_vm1, 1.0, %v5750_v52  ;;  %v2504_v15 = vsel %vm675_vm2, 1.0, %v5750_v52  ;;  %v2505_v12 = vsel %vm676_vm9, 1.0, %v5750_v52  ;;  %vm1408_vm7 = vcmp.eq.s32.totalorder %v4207_v38, %v3809_v50 }
  0xd4   : > { %v889_v35 = vadd.f32 %v3907_v25, %v2502_v14  ;;  %3228 = vset.pattern.permute.xlu1 %v5759_v44  ;;  %v891_v30 = vadd.f32 %v3932_v36, %v2504_v15  ;;  %v4232_v25 = vsel %vm957_vm3, 1.0, %v5750_v52  ;;  %v4238_v14 = vsel %vm958_vm4, 1.0, %v5750_v52 }
  0xd5   : > { %1697 = vperm.xlu1 %3228, %v3484_v34   ;;  %5760 = vst [vmem:[#allocation27_spill] sm:$0xff] %v4232_v25  ;;  %5761 = vst [vmem:[#allocation28_spill] sm:$0xff] %v4238_v14  ;;  %v2503_v34 = vsel %vm674_vm5, 1.0, %v5750_v52  ;;  %v657_v28 = vpop.permute.xlu0 %656  ;;  %v4247_v15 = vsel %vm959_vm6, 1.0, %v5750_v52  ;;  %v5768_v25 = vmov 5   ;;  %vm1405_vm4 = vcmp.eq.s32.totalorder %v4207_v38, %v3798_v46 }
  0xd6   : > { %v1041_v36 = vadd.f32 %v3827_v54, %v889_v35  ;;  %5762 = vst [vmem:[#allocation29_spill] sm:$0xff] %v4247_v15  ;;  %v4259_v54 = vsel %vm969_vm8, 1.0, %v5750_v52  ;;  %v1043_v35 = vadd.f32 %v3833_v57, %v891_v30  ;;  %v5765_v15 = vmov 4  }
  0xd7   : > { %v4244_v41 = vpop.permute.xlu1 %1682  ;;  %5764 = vst [vmem:[#allocation31_spill] sm:$0xff] %v4259_v54  ;;  %v890_v14 = vadd.f32 %v3917_v32, %v2503_v34  ;;  %vm681_vm15 = vcmp.eq.s32.totalorder %v657_v28, %v3798_v46  ;;  %v2546_v54 = vsel %vm805_vm11, 1.0, %v5750_v52  ;;  %v2547_v57 = vsel %vm806_vm12, 1.0, %v5750_v52 }
  0xd8   : > { %v1193_v30 = vadd.f32 %v4098_v37, %v1041_v36  ;;  %vm682_vm1 = vcmp.eq.s32.totalorder %v657_v28, %v3802_v49  ;;  %vm683_vm2 = vcmp.eq.s32.totalorder %v657_v28, %v3806_v31  ;;  %vm684_vm3 = vcmp.eq.s32.totalorder %v657_v28, %v3809_v50 }
  0xd9   : > { %3229 = vset.pattern.permute.xlu1 %v5765_v15  ;;  %v892_v15 = vadd.f32 %v3938_v39, %v2505_v12  ;;  %v2548_v34 = vsel %vm807_vm14, 1.0, %v5750_v52  ;;  %v1195_v37 = vadd.f32 %v4116_v43, %v1043_v35  ;;  %v2510_v39 = vsel %vm681_vm15, 1.0, %v5750_v52 }
  0xda   : > { %1247 = vperm.xlu1 %3229, %v3685_v58   ;;  %v2549_v36 = vsel %vm808_vm0, 1.0, %v5750_v52  ;;  %v4293_v12 = vadd.f32 %v2546_v54, %v2514_v7  ;;  %v4295_v45 = vadd.f32 %v2547_v57, %v2515_v27  ;;  %v1042_v28 = vadd.f32 %v3830_v55, %v890_v14 }
  0xdb   : > { %v2511_v48 = vsel %vm682_vm1, 1.0, %v5750_v52  ;;  %v2512_v8 = vsel %vm683_vm2, 1.0, %v5750_v52  ;;  %v2513_v51 = vsel %vm684_vm3, 1.0, %v5750_v52  ;;  %v1345_v43 = vadd.f32 %v3974_v53, %v1193_v30 }
  0xdc   : > { %v4281_v32 = vpop.permute.xlu1 %1232  ;;  %v1044_v35 = vadd.f32 %v3836_v59, %v892_v15  ;;  %vm1406_vm5 = vcmp.eq.s32.totalorder %v4207_v38, %v3802_v49  ;;  %v897_v55 = vadd.f32 %v4043_v63, %v2510_v39  ;;  %v4310_v7 = vadd.f32 %v2548_v34, %v2516_v40  ;;  %v5772_v42 = vld [vmem:[#allocation28_spill] sm:$0xff] }
  0xdd   : > { %v4312_v27 = vadd.f32 %v2549_v36, %v2517_v47  ;;  %vm1407_vm6 = vcmp.eq.s32.totalorder %v4207_v38, %v3806_v31  ;;  %v1347_v53 = vadd.f32 %v3992_v3, %v1195_v37  ;;  %v898_v59 = vadd.f32 %v4051_v21, %v2511_v48  ;;  %v5769_v36 = vld [vmem:[#allocation21_spill] sm:$0xff] }
  0xde   : > { %3231 = vset.pattern.permute.xlu1 %v5768_v25  ;;  %v899_v14 = vadd.f32 %v4060_v22, %v2512_v8  ;;  %v900_v63 = vadd.f32 %v4063_v23, %v2513_v51  ;;  %v1194_v40 = vadd.f32 %v4103_v2, %v1042_v28  ;;  %v2666_v47 = vsel %vm1405_vm4, 1.0, %v5750_v52 }
  0xdf   : > { %1399 = vperm.xlu1 %3231, %v3685_v58   ;;  %v2667_v54 = vsel %vm1406_vm5, 1.0, %v5750_v52  ;;  %v1497_v57 = vadd.f32 %v3839_v60, %v1345_v43  ;;  %v1196_v3 = vadd.f32 %v4119_v33, %v1044_v35  ;;  %v1049_v30 = vadd.f32 %v4124_v29, %v897_v55  ;;  %v5770_v43 = vld [vmem:[#allocation22_spill] sm:$0xff] }
  0xe0   : > { %vm1705_vm8 = vcmp.eq.s32.totalorder %v4244_v41, %v3798_v46  ;;  %vm1707_vm9 = vcmp.eq.s32.totalorder %v4244_v41, %v3806_v31  ;;  %v2668_v60 = vsel %vm1407_vm6, 1.0, %v5750_v52  ;;  %v2669_v48 = vsel %vm1408_vm7, 1.0, %v5750_v52 }
  0xe1   : > { %v4317_v25 = vpop.permute.xlu1 %1533  ;;  %v1499_v51 = vadd.f32 %v3847_v26, %v1347_v53  ;;  %vm1706_vm11 = vcmp.eq.s32.totalorder %v4244_v41, %v3802_v49  ;;  %v1051_v21 = vadd.f32 %v4135_v56, %v899_v14  ;;  %v1052_v22 = vadd.f32 %v4138_v24, %v900_v63  ;;  %v5771_v14 = vld [vmem:[#allocation27_spill] sm:$0xff] }
  0xe2   : > { %vm1708_vm12 = vcmp.eq.s32.totalorder %v4244_v41, %v3809_v50  ;;  %v1649_v2 = vadd.f32 %v4006_v11, %v1497_v57  ;;  %v2726_v33 = vsel %vm1705_vm8, 1.0, %v5750_v52  ;;  %v2728_v26 = vsel %vm1707_vm9, 1.0, %v5750_v52  ;;  %v5774_v57 = vld [vmem:[#allocation30_spill] sm:$0xff] }
  0xe3   : > { %3232 = vset.pattern.permute.xlu1 %v5759_v44  ;;  %v1346_v29 = vadd.f32 %v3985_v0, %v1194_v40  ;;  %v1201_v44 = vadd.f32 %v4152_v1, %v1049_v30  ;;  %vm1257_vm13 = vcmp.eq.s32.totalorder %v4281_v32, %v3798_v46  ;;  %vm1258_vm14 = vcmp.eq.s32.totalorder %v4281_v32, %v3802_v49 }
  0xe4   : > { %1700 = vperm.xlu1 %3232, %v3614_v16   ;;  %v1050_v16 = vadd.f32 %v4132_v13, %v898_v59  ;;  %v1348_v13 = vadd.f32 %v3995_v4, %v1196_v3  ;;  %v1651_v11 = vadd.f32 %v4028_v18, %v1499_v51  ;;  %vm1259_vm15 = vcmp.eq.s32.totalorder %v4281_v32, %v3806_v31 }
  0xe5   : > { %vm1260_vm0 = vcmp.eq.s32.totalorder %v4281_v32, %v3809_v50  ;;  %v1498_v1 = vadd.f32 %v3842_v61, %v1346_v29  ;;  %v1203_v56 = vadd.f32 %v4170_v5, %v1051_v21  ;;  %v1204_v24 = vadd.f32 %v4173_v9, %v1052_v22  ;;  %v663_v5 = vpop.permute.xlu0 %662 }
  0xe6   : > { %v4354_v23 = vpop.permute.xlu1 %782  ;;  %v1202_v0 = vadd.f32 %v4161_v20, %v1050_v16  ;;  %v1500_v4 = vadd.f32 %v3850_v62, %v1348_v13  ;;  %v1801_v38 = vadd.f32 %v2726_v33, %v1649_v2  ;;  %v2639_v18 = vsel %vm1258_vm14, 1.0, %v5750_v52 }
  0xe7   : > { %v1650_v15 = vadd.f32 %v4025_v17, %v1498_v1  ;;  %v2640_v32 = vsel %vm1259_vm15, 1.0, %v5750_v52  ;;  %v2641_v61 = vsel %vm1260_vm0, 1.0, %v5750_v52  ;;  %v2727_v9 = vsel %vm1706_vm11, 1.0, %v5750_v52 }
  0xe8   : > { %1703 = vperm.xlu1 %3232, %v3685_v58   ;;  %v2638_v58 = vsel %vm1257_vm13, 1.0, %v5750_v52  ;;  %v1652_v62 = vadd.f32 %v4031_v19, %v1500_v4  ;;  %v4390_v20 = vadd.f32 %v2666_v47, %v4175_v6  ;;  %v1803_v34 = vadd.f32 %v2728_v26, %v1651_v11  ;;  %v5773_v47 = vld [vmem:[#allocation29_spill] sm:$0xff] }
  0xe9   : > { %v1802_v37 = vadd.f32 %v2727_v9, %v1650_v15  ;;  %v2729_v17 = vsel %vm1708_vm12, 1.0, %v5750_v52  ;;  %v4397_v39 = vadd.f32 %v2667_v54, %v4177_v10  ;;  %v4400_v28 = vadd.f32 %v2668_v60, %v5769_v36 }
  0xea   : > { %v4403_v35 = vadd.f32 %v2669_v48, %v5770_v43  ;;  %v1804_v19 = vadd.f32 %v2729_v17, %v1652_v62  ;;  %v4405_v55 = vadd.f32 %v2638_v58, %v1201_v44  ;;  %v4407_v6 = vadd.f32 %v2639_v18, %v1202_v0 }
  0xeb   : > { %v4380_v8 = vpop.permute.xlu1 %1083  ;;  %v4409_v53 = vadd.f32 %v2640_v32, %v1203_v56  ;;  %v4411_v59 = vadd.f32 %v2641_v61, %v1204_v24  ;;  %2025 = vmatprep.mubr.f32.mxu0 %v1802_v37  ;;  %v4417_v10 = vsel %vm972_vm10, 1.0, %v5750_v52  ;;  %vm1557_vm1 = vcmp.eq.s32.totalorder %v4317_v25, %v3798_v46 }
  0xec   : > { %vm1558_vm2 = vcmp.eq.s32.totalorder %v4317_v25, %v3802_v49  ;;  %2130 = vmatprep.mubr.f32.mxu1 %v1804_v19  ;;  %2026 = vmatmul.mubr.f32.vlgmr.msra.gmra.mrb[16].mxu0 %v1801_v38  ;;  %vm689_vm3 = vcmp.eq.s32.totalorder %v663_v5, %v3798_v46  ;;  %v1053_v63 = vadd.f32 %v5771_v14, %v4293_v12  ;;  %v2698_v12 = vsel %vm1557_vm1, 1.0, %v5750_v52 }
  0xed   : > { %2131 = vmatmul.mubr.f32.vlgmr.msra.gmra.mrb[16].mxu1 %v1803_v34  ;;  %v4430_v40 = vadd.f32 %v5772_v42, %v4295_v45  ;;  %v4434_v54 = vadd.f32 %v5773_v47, %v4310_v7  ;;  %v4438_v3 = vadd.f32 %v5774_v57, %v4312_v27  ;;  %vm1559_vm4 = vcmp.eq.s32.totalorder %v4317_v25, %v3806_v31  ;;  %v4447_v45 = vpop.permute.xlu0 %671 }
  0xee   : > { %vm690_vm5 = vcmp.eq.s32.totalorder %v663_v5, %v3802_v49  ;;  %vm809_vm6 = vcmp.eq.s32.totalorder %v4354_v23, %v3798_v46  ;;  %vm810_vm7 = vcmp.eq.s32.totalorder %v4354_v23, %v3802_v49  ;;  %vm691_vm8 = vcmp.eq.s32.totalorder %v663_v5, %v3806_v31 }
  0xef   : > { %vm692_vm9 = vcmp.eq.s32.totalorder %v663_v5, %v3809_v50  ;;  %vm811_vm10 = vcmp.eq.s32.totalorder %v4354_v23, %v3806_v31  ;;  %vm812_vm11 = vcmp.eq.s32.totalorder %v4354_v23, %v3809_v50  ;;  %vm1560_vm12 = vcmp.eq.s32.totalorder %v4317_v25, %v3809_v50 }
  0xf0   : > { %v4424_v41 = vpop.permute.xlu1 %1685  ;;  %v2699_v7 = vsel %vm1558_vm2, 1.0, %v5750_v52  ;;  %v2518_v27 = vsel %vm689_vm3, 1.0, %v5750_v52  ;;  %v2519_v60 = vsel %vm690_vm5, 1.0, %v5750_v52  ;;  %v2550_v48 = vsel %vm809_vm6, 1.0, %v5750_v52 }
  0xf1   : > { %v2551_v51 = vsel %vm810_vm7, 1.0, %v5750_v52  ;;  %vm1109_vm13 = vcmp.eq.s32.totalorder %v4380_v8, %v3798_v46  ;;  %v2520_v22 = vsel %vm691_vm8, 1.0, %v5750_v52  ;;  %v2521_v23 = vsel %vm692_vm9, 1.0, %v5750_v52  ;;  %v4509_v0 = vpop.permute.xlu0 %1235 }
  0xf2   : > { %v2552_v2 = vsel %vm811_vm10, 1.0, %v5750_v52  ;;  %v2553_v33 = vsel %vm812_vm11, 1.0, %v5750_v52  ;;  %v2700_v29 = vsel %vm1559_vm4, 1.0, %v5750_v52  ;;  %v2701_v44 = vsel %vm1560_vm12, 1.0, %v5750_v52 }
  0xf3   : > { %vm1110_vm14 = vcmp.eq.s32.totalorder %v4380_v8, %v3802_v49  ;;  %vm1111_vm15 = vcmp.eq.s32.totalorder %v4380_v8, %v3806_v31  ;;  %v4499_v11 = vadd.f32 %v2550_v48, %v2518_v27  ;;  %v4501_v1 = vadd.f32 %v2551_v51, %v2519_v60 }
  0xf4   : > { %v4468_v30 = vpop.f32.mrb[0].mxu0  ;;  %vm1112_vm0 = vcmp.eq.s32.totalorder %v4380_v8, %v3809_v50  ;;  %v2610_v25 = vsel %vm1109_vm13, 1.0, %v5750_v52  ;;  %v4511_v56 = vadd.f32 %v2552_v2, %v2520_v22  ;;  %v4513_v24 = vadd.f32 %v2553_v33, %v2521_v23 }
  0xf5   : > { %5775 = vst [vmem:[#allocation21_spill] sm:$0xff] %v4468_v30  ;;  %v4475_v16 = vpop.permute.xlu1 %934  ;;  %v4477_v21 = vpop.f32.mrb[1].mxu0  ;;  %vm1710_vm1 = vcmp.eq.s32.totalorder %v4424_v41, %v3802_v49  ;;  %vm1712_vm2 = vcmp.eq.s32.totalorder %v4424_v41, %v3809_v50  ;;  %v4522_v38 = vsel %vm1110_vm14, 1.0, %v5750_v52  ;;  %v4525_v58 = vsel %vm1111_vm15, 1.0, %v5750_v52  ;;  %v1883_v30 = vld [vmem:[%s5720_s4 + $0x190] sm:$0xff] }
  0xf6   : > { %5776 = vst [vmem:[#allocation22_spill] sm:$0xff] %v4477_v21  ;;  %v4483_v26 = vpop.f32.mrb[0].mxu1  ;;  %vm1709_vm3 = vcmp.eq.s32.totalorder %v4424_v41, %v3798_v46  ;;  %vm1711_vm4 = vcmp.eq.s32.totalorder %v4424_v41, %v3806_v31  ;;  %v4534_v8 = vsel %vm1112_vm0, 1.0, %v5750_v52  ;;  %v4536_v32 = vadd.f32 %v2610_v25, %v1053_v63  ;;  %v5791_v25 = vld [vmem:[#allocation10_spill] sm:$0xff] }
  0xf7   : > { %5777 = vst [vmem:[#allocation27_spill] sm:$0xff] %v4483_v26  ;;  %v4497_v13 = vpop.f32.mrb[1].mxu1  ;;  %vm1261_vm5 = vcmp.eq.s32.totalorder %v4509_v0, %v3798_v46  ;;  %vm1262_vm6 = vcmp.eq.s32.totalorder %v4509_v0, %v3802_v49  ;;  %vm1263_vm7 = vcmp.eq.s32.totalorder %v4509_v0, %v3806_v31  ;;  %v1654_v9 = vadd.f32 %v2699_v7, %v4397_v39 }
  0xf8   : > { %5778 = vst [vmem:[#allocation28_spill] sm:$0xff] %v4497_v13  ;;  %v2731_v62 = vsel %vm1710_vm1, 1.0, %v5750_v52  ;;  %v1656_v5 = vadd.f32 %v2701_v44, %v4403_v35  ;;  %v2733_v34 = vsel %vm1712_vm2, 1.0, %v5750_v52  ;;  %v1653_v17 = vadd.f32 %v2698_v12, %v4390_v20 }
  0xf9   : > { %v4519_v4 = vpop.f32.mrb[2].mxu0  ;;  %v2730_v39 = vsel %vm1709_vm3, 1.0, %v5750_v52  ;;  %v1655_v36 = vadd.f32 %v2700_v29, %v4400_v28  ;;  %v2732_v43 = vsel %vm1711_vm4, 1.0, %v5750_v52  ;;  %v1806_v19 = vadd.f32 %v2731_v62, %v1654_v9  ;;  %v5790_v29 = vld [vmem:[#allocation9_spill] sm:$0xff]  ;;  %v5792_v9 = vld [vmem:[#allocation11_spill] sm:$0xff] }
  0xfa   : > { %5779 = vst [vmem:[#allocation29_spill] sm:$0xff] %v4519_v4  ;;  %v1537_v18 = vpop.permute.xlu1 %1536  ;;  %v4531_v15 = vpop.f32.mrb[3].mxu0  ;;  %v1808_v14 = vadd.f32 %v2733_v34, %v1656_v5  ;;  %vm701_vm10 = vcmp.eq.s32.totalorder %v4447_v45, %v3798_v46  ;;  %v1805_v28 = vadd.f32 %v2730_v39, %v1653_v17  ;;  %vm1264_vm13 = vcmp.eq.s32.totalorder %v4509_v0, %v3809_v50  ;;  %v5794_v34 = vld [vmem:[#allocation12_spill] sm:$0xff]  ;;  %v5795_v39 = vld [vmem:[#allocation6_spill] sm:$0xff] }
  0xfb   : > { %5780 = vst [vmem:[#allocation30_spill] sm:$0xff] %v4531_v15  ;;  %v4542_v61 = vpop.f32.mrb[2].mxu1  ;;  %vm1561_vm8 = vcmp.eq.s32.totalorder %v1537_v18, %v3798_v46  ;;  %vm1562_vm9 = vcmp.eq.s32.totalorder %v1537_v18, %v3802_v49  ;;  %v1807_v42 = vadd.f32 %v2732_v43, %v1655_v36  ;;  %vm1563_vm11 = vcmp.eq.s32.totalorder %v1537_v18, %v3806_v31  ;;  %v5796_v43 = vld [vmem:[#allocation8_spill] sm:$0xff] }
  0xfc   : > { %5781 = vst [vmem:[#allocation34_spill] sm:$0xff] %v4542_v61  ;;  %v4556_v37 = vpop.f32.mrb[3].mxu1  ;;  %vm1564_vm12 = vcmp.eq.s32.totalorder %v1537_v18, %v3809_v50  ;;  %2030 = vmatprep.mubr.f32.mxu0 %v1806_v19  ;;  %2135 = vmatprep.mubr.f32.mxu1 %v1808_v14  ;;  %v2702_v57 = vsel %vm1561_vm8, 1.0, %v5750_v52  ;;  %v2703_v12 = vsel %vm1562_vm9, 1.0, %v5750_v52  ;;  %v2704_v7 = vsel %vm1563_vm11, 1.0, %v5750_v52  ;;  %v5797_v14 = vld [vmem:[#allocation5_spill] sm:$0xff] }
  0xfd   : > { %5782 = vst [vmem:[#allocation35_spill] sm:$0xff] %v4556_v37  ;;  %v4568_v35 = vpop.f32.mrb[4].mxu0  ;;  %2031 = vmatmul.mubr.f32.gmra.mrb[18].mxu0 %v1805_v28  ;;  %2136 = vmatmul.mubr.f32.gmra.mrb[18].mxu1 %v1807_v42  ;;  %v2705_v27 = vsel %vm1564_vm12, 1.0, %v5750_v52  ;;  %v1506_v36 = vadd.f32 %v5795_v39, %v4407_v6  ;;  %v1508_v19 = vadd.f32 %v5796_v43, %v4411_v59  ;;  %v5798_v6 = vld [vmem:[#allocation7_spill] sm:$0xff]  ;;  %v5804_v39 = vld [vmem:[#allocation14_spill] sm:$0xff] }
  0xfe   : > { %5783 = vst [vmem:[#allocation36_spill] sm:$0xff] %v4568_v35  ;;  %v4572_v20 = vpop.f32.mrb[5].mxu0  ;;  %v4574_v63 = vpop.f32.mrb[4].mxu1  ;;  %v1505_v28 = vadd.f32 %v5797_v14, %v4405_v55  ;;  %v2643_v55 = vsel %vm1262_vm6, 1.0, %v5750_v52  ;;  %vm702_vm2 = vcmp.eq.s32.totalorder %v4447_v45, %v3802_v49  ;;  %vm703_vm3 = vcmp.eq.s32.totalorder %v4447_v45, %v3806_v31 }
  0xff   : > { %5784 = vst [vmem:[#allocation37_spill] sm:$0xff] %v4572_v20  ;;  %5785 = vst [vmem:[#allocation38_spill] sm:$0xff] %v4574_v63  ;;  %v666_v41 = vpop.permute.xlu1 %665  ;;  %v4580_v47 = vpop.f32.mrb[5].mxu1  ;;  %vm704_vm4 = vcmp.eq.s32.totalorder %v4447_v45, %v3809_v50  ;;  %vm962_vm6 = vcmp.eq.s32.totalorder %v4475_v16, %v3802_v49  ;;  %v4677_v14 = vsel %vm701_vm10, 1.0, %v5750_v52  ;;  %vm964_vm8 = vcmp.eq.s32.totalorder %v4475_v16, %v3809_v50  ;;  %v1852_v63 = vld [vmem:[%s5720_s4 + $0x98] sm:$0xff] }
 0x100   : > { %5786 = vst [vmem:[#allocation39_spill] sm:$0xff] %v4580_v47  ;;  %vm693_vm14 = vcmp.eq.s32.totalorder %v666_v41, %v3798_v46  ;;  %vm694_vm15 = vcmp.eq.s32.totalorder %v666_v41, %v3802_v49  ;;  %vm695_vm0 = vcmp.eq.s32.totalorder %v666_v41, %v3806_v31  ;;  %vm696_vm1 = vcmp.eq.s32.totalorder %v666_v41, %v3809_v50 }
 0x101   : > { %v4591_v60 = vpop.f32.mrb[6].mxu0  ;;  %v2522_v48 = vsel %vm693_vm14, 1.0, %v5750_v52  ;;  %v2523_v51 = vsel %vm694_vm15, 1.0, %v5750_v52  ;;  %v2524_v22 = vsel %vm695_vm0, 1.0, %v5750_v52  ;;  %v2525_v33 = vsel %vm696_vm1, 1.0, %v5750_v52 }
 0x102   : > { %5787 = vst [vmem:[#allocation40_spill] sm:$0xff] %v4591_v60  ;;  %v4597_v23 = vpop.f32.mrb[7].mxu0  ;;  %v4599_v2 = vpop.f32.mrb[6].mxu1  ;;  %v4603_v44 = vadd.f32 %v5790_v29, %v2522_v48  ;;  %v4606_v18 = vadd.f32 %v5791_v25, %v2523_v51  ;;  %v4609_v62 = vadd.f32 %v5792_v9, %v2524_v22  ;;  %v4614_v17 = vadd.f32 %v5794_v34, %v2525_v33  ;;  %v5803_v9 = vld [vmem:[#allocation13_spill] sm:$0xff] }
 0x103   : > { %5788 = vst [vmem:[#allocation41_spill] sm:$0xff] %v4597_v23  ;;  %5789 = vst [vmem:[#allocation42_spill] sm:$0xff] %v4599_v2  ;;  %v4611_v5 = vpop.f32.mrb[7].mxu1  ;;  %v1206_v41 = vadd.f32 %v4522_v38, %v4430_v40  ;;  %v1207_v48 = vadd.f32 %v4525_v58, %v4434_v54  ;;  %v2642_v51 = vsel %vm1261_vm5, 1.0, %v5750_v52  ;;  %v1507_v22 = vadd.f32 %v5798_v6, %v4409_v53  ;;  %v1866_v2 = vld [vmem:[%s5720_s4 + $0x108] sm:$0xff] }
 0x104   : > { %5793 = vst [vmem:[#allocation9_spill] sm:$0xff] %v4611_v5  ;;  %v4622_v42 = vpop.permute.xlu1 %1086  ;;  %v1658_v33 = vadd.f32 %v2703_v12, %v1506_v36  ;;  %v1660_v40 = vadd.f32 %v2705_v27, %v1508_v19  ;;  %v1657_v38 = vadd.f32 %v2702_v57, %v1505_v28  ;;  %v1208_v58 = vadd.f32 %v4534_v8, %v4438_v3  ;;  %v5805_v3 = vld [vmem:[#allocation15_spill] sm:$0xff] }
 0x105   : > { %v4634_v59 = vpop.f32.mrb[8].mxu0  ;;  %v2644_v53 = vsel %vm1263_vm7, 1.0, %v5750_v52  ;;  %v2645_v25 = vsel %vm1264_vm13, 1.0, %v5750_v52  ;;  %v1659_v12 = vadd.f32 %v2704_v7, %v1507_v22  ;;  %v1357_v57 = vadd.f32 %v2642_v51, %v4536_v32  ;;  %v5806_v32 = vld [vmem:[#allocation16_spill] sm:$0xff]  ;;  %v4932_v5 = vld [vmem:[%s5720_s4 + $0x10] sm:$0xff] }
 0x106   : > { %5799 = vst [vmem:[#allocation10_spill] sm:$0xff] %v4634_v59  ;;  %v4640_v29 = vpop.f32.mrb[9].mxu0  ;;  %v4642_v54 = vpop.f32.mrb[8].mxu1  ;;  %v1810_v34 = vadd.f32 %v5803_v9, %v1658_v33  ;;  %v1812_v36 = vadd.f32 %v5804_v39, %v1660_v40  ;;  %v1809_v8 = vadd.f32 %v5805_v3, %v1657_v38  ;;  %v1358_v0 = vadd.f32 %v2643_v55, %v1206_v41  ;;  %v1865_v59 = vld [vmem:[%s5720_s4 + $0x100] sm:$0xff] }
 0x107   : > { %5800 = vst [vmem:[#allocation11_spill] sm:$0xff] %v4640_v29  ;;  %5801 = vst [vmem:[#allocation12_spill] sm:$0xff] %v4642_v54  ;;  %v4654_v27 = vpop.f32.mrb[9].mxu1  ;;  %vm961_vm5 = vcmp.eq.s32.totalorder %v4475_v16, %v3798_v46  ;;  %v1811_v7 = vadd.f32 %v5806_v32, %v1659_v12  ;;  %vm963_vm7 = vcmp.eq.s32.totalorder %v4475_v16, %v3806_v31  ;;  %v2583_v38 = vsel %vm962_vm6, 1.0, %v5750_v52 }
 0x108   : > { %5802 = vst [vmem:[#allocation6_spill] sm:$0xff] %v4654_v27  ;;  %2035 = vmatprep.mubr.f32.mxu0 %v1810_v34  ;;  %2140 = vmatprep.mubr.f32.mxu1 %v1812_v36  ;;  %v1359_v22 = vadd.f32 %v2644_v53, %v1207_v48  ;;  %v1360_v55 = vadd.f32 %v2645_v25, %v1208_v58  ;;  %v2582_v33 = vsel %vm961_vm5, 1.0, %v5750_v52  ;;  %v2584_v12 = vsel %vm963_vm7, 1.0, %v5750_v52 }
 0x109   : > { %v1388_v43 = vpop.permute.xlu1 %1387  ;;  %v4671_v19 = vpop.f32.mrb[10].mxu0  ;;  %2036 = vmatmul.mubr.f32.gmra.mrb[20].mxu0 %v1809_v8  ;;  %2141 = vmatmul.mubr.f32.gmra.mrb[20].mxu1 %v1811_v7  ;;  %v2585_v48 = vsel %vm964_vm8, 1.0, %v5750_v52  ;;  %vm1113_vm13 = vcmp.eq.s32.totalorder %v4622_v42, %v3798_v46  ;;  %vm1114_vm5 = vcmp.eq.s32.totalorder %v4622_v42, %v3802_v49  ;;  %vm1116_vm6 = vcmp.eq.s32.totalorder %v4622_v42, %v3809_v50 }
 0x10a   : > { %5807 = vst [vmem:[#allocation8_spill] sm:$0xff] %v4671_v19  ;;  %vm1414_vm9 = vcmp.eq.s32.totalorder %v1388_v43, %v3802_v49  ;;  %v4684_v28 = vpop.f32.mrb[11].mxu0  ;;  %v4686_v41 = vpop.f32.mrb[10].mxu1  ;;  %vm1413_vm11 = vcmp.eq.s32.totalorder %v1388_v43, %v3798_v46  ;;  %vm1415_vm10 = vcmp.eq.s32.totalorder %v1388_v43, %v3806_v31  ;;  %vm1416_vm12 = vcmp.eq.s32.totalorder %v1388_v43, %v3809_v50  ;;  %v5817_v19 = vld [vmem:[#allocation20_spill] sm:$0xff] }
 0x10b   : > { %5808 = vst [vmem:[#allocation5_spill] sm:$0xff] %v4684_v28  ;;  %5809 = vst [vmem:[#allocation7_spill] sm:$0xff] %v4686_v41  ;;  %v2675_v51 = vsel %vm1414_vm9, 1.0, %v5750_v52  ;;  %v4692_v6 = vpop.f32.mrb[11].mxu1  ;;  %v2677_v40 = vsel %vm1416_vm12, 1.0, %v5750_v52  ;;  %v2674_v53 = vsel %vm1413_vm11, 1.0, %v5750_v52  ;;  %v1058_v45 = vadd.f32 %v2583_v38, %v4501_v1 }
 0x10c   : > { %5810 = vst [vmem:[#allocation13_spill] sm:$0xff] %v4692_v6  ;;  %v2676_v25 = vsel %vm1415_vm10, 1.0, %v5750_v52  ;;  %v1510_v9 = vadd.f32 %v2675_v51, %v1358_v0  ;;  %v1512_v34 = vadd.f32 %v2677_v40, %v1360_v55  ;;  %v5816_v41 = vld [vmem:[#allocation18_spill] sm:$0xff]  ;;  %v2617_v1 = vsel %vm1116_vm6, 1.0, %v5750_v52 }
 0x10d   : > { %v4713_v58 = vpop.f32.mrb[12].mxu0  ;;  %v3102_v21 = vpack.c.bf16 %v1866_v2, %v1865_v59  ;;  %v1867_v2 = vld [vmem:[%s5720_s4 + $0x110] sm:$0xff] }
 0x10e   : > { %5811 = vst [vmem:[#allocation14_spill] sm:$0xff] %v4713_v58  ;;  %v938_v39 = vpop.permute.xlu1 %937  ;;  %v4717_v36 = vpop.f32.mrb[13].mxu0  ;;  %v1511_v58 = vadd.f32 %v2676_v25, %v1359_v22  ;;  %v4741_v54 = vadd.f32 %v5817_v19, %v1512_v34  ;;  %v5823_v22 = vld [vmem:[#allocation26_spill] sm:$0xff]  ;;  %v4765_v19 = vsel %vm702_vm2, 1.0, %v5750_v52  ;;  %v4771_v25 = vsel %vm703_vm3, 1.0, %v5750_v52 }
 0x10f   : > { %5812 = vst [vmem:[#allocation15_spill] sm:$0xff] %v4717_v36  ;;  %vm965_vm14 = vcmp.eq.s32.totalorder %v938_v39, %v3798_v46  ;;  %vm966_vm15 = vcmp.eq.s32.totalorder %v938_v39, %v3802_v49  ;;  %vm967_vm0 = vcmp.eq.s32.totalorder %v938_v39, %v3806_v31  ;;  %vm968_vm1 = vcmp.eq.s32.totalorder %v938_v39, %v3809_v50  ;;  %v4723_v16 = vpop.f32.mrb[12].mxu1  ;;  %v1245_v34 = vpop.permute.xlu0 %1244 }
 0x110   : > { %5813 = vst [vmem:[#allocation16_spill] sm:$0xff] %v4723_v16  ;;  %v2586_v3 = vsel %vm965_vm14, 1.0, %v5750_v52  ;;  %v2587_v8 = vsel %vm966_vm15, 1.0, %v5750_v52  ;;  %v2588_v0 = vsel %vm967_vm0, 1.0, %v5750_v52  ;;  %v2589_v32 = vsel %vm968_vm1, 1.0, %v5750_v52  ;;  %v4729_v7 = vpop.f32.mrb[13].mxu1 }
 0x111   : > { %5814 = vst [vmem:[#allocation43_spill] sm:$0xff] %v4729_v7  ;;  %v1061_v43 = vadd.f32 %v2586_v3, %v4603_v44  ;;  %v1062_v51 = vadd.f32 %v2587_v8, %v4606_v18  ;;  %v1063_v55 = vadd.f32 %v2588_v0, %v4609_v62  ;;  %v1064_v40 = vadd.f32 %v2589_v32, %v4614_v17  ;;  %v4735_v39 = vpop.f32.mrb[14].mxu0  ;;  %v5820_v18 = vld [vmem:[#allocation23_spill] sm:$0xff]  ;;  %v5821_v62 = vld [vmem:[#allocation24_spill] sm:$0xff]  ;;  %v5822_v8 = vld [vmem:[#allocation25_spill] sm:$0xff] }
 0x112   : > { %5815 = vst [vmem:[#allocation44_spill] sm:$0xff] %v4735_v39  ;;  %v1509_v16 = vadd.f32 %v2674_v53, %v1357_v57  ;;  %v4738_v36 = vadd.f32 %v5816_v41, %v1510_v9  ;;  %v4743_v6 = vpop.f32.mrb[15].mxu0  ;;  %v4745_v7 = vpop.f32.mrb[14].mxu1  ;;  %v4777_v9 = vsel %vm704_vm4, 1.0, %v5750_v52  ;;  %v1057_v0 = vadd.f32 %v2582_v33, %v4499_v11  ;;  %v5826_v33 = vld [vmem:[#allocation17_spill] sm:$0xff]  ;;  %v1882_v39 = vld [vmem:[%s5720_s4 + $0x188] sm:$0xff] }
 0x113   : > { %5818 = vst [vmem:[#allocation18_spill] sm:$0xff] %v4743_v6  ;;  %5819 = vst [vmem:[#allocation20_spill] sm:$0xff] %v4745_v7  ;;  %v1239_v44 = vpop.permute.xlu1 %1238  ;;  %v4748_v3 = vadd.f32 %v5820_v18, %v1061_v43  ;;  %v4751_v17 = vadd.f32 %v5821_v62, %v1062_v51  ;;  %v4754_v57 = vadd.f32 %v5822_v8, %v1063_v55  ;;  %v4759_v53 = vpop.f32.mrb[15].mxu1  ;;  %v2614_v32 = vsel %vm1113_vm13, 1.0, %v5750_v52  ;;  %v5827_v62 = vld [vmem:[#allocation19_spill] sm:$0xff]  ;;  %v1881_v7 = vld [vmem:[%s5720_s4 + $0x180] sm:$0xff] }
 0x114   : > { %v4757_v41 = vadd.f32 %v5823_v22, %v1064_v40  ;;  %5824 = vst [vmem:[#allocation23_spill] sm:$0xff] %v4759_v53  ;;  %vm1115_vm2 = vcmp.eq.s32.totalorder %v4622_v42, %v3806_v31  ;;  %v1059_v43 = vadd.f32 %v2584_v12, %v4511_v56  ;;  %v1060_v51 = vadd.f32 %v2585_v48, %v4513_v24  ;;  %v1394_v48 = vpop.permute.xlu0 %1393 }
 0x115   : > { %v5825_v55 = vlaneseq  ;;  %v2615_v11 = vsel %vm1114_vm5, 1.0, %v5750_v52  ;;  %vm1265_vm3 = vcmp.eq.s32.totalorder %v1239_v44, %v3798_v46  ;;  %v4799_v18 = vadd.f32 %v5826_v33, %v1509_v16 }
 0x116   : > { %v4802_v8 = vadd.f32 %v5827_v62, %v1511_v58  ;;  %v2616_v42 = vsel %vm1115_vm2, 1.0, %v5750_v52  ;;  %v1209_v56 = vadd.f32 %v2614_v32, %v1057_v0  ;;  %vm1266_vm4 = vcmp.eq.s32.totalorder %v1239_v44, %v3802_v49  ;;  %v1834_v0 = vld [vmem:[%s5720_s4 + $0x8] sm:$0xff] }
 0x117   : > { %v4794_v40 = vshrl.u32 %v5825_v55, 7  ;;  %vm1267_vm7 = vcmp.eq.s32.totalorder %v1239_v44, %v3806_v31  ;;  %vm1268_vm8 = vcmp.eq.s32.totalorder %v1239_v44, %v3809_v50  ;;  %vm1273_vm9 = vcmp.eq.s32.totalorder %v1245_v34, %v3798_v46 }
 0x118   : > { %v669_v24 = vpop.permute.xlu1 %668  ;;  %vm1274_vm11 = vcmp.eq.s32.totalorder %v1245_v34, %v3802_v49  ;;  %v1210_v38 = vadd.f32 %v2615_v11, %v1058_v45  ;;  %v2646_v12 = vsel %vm1265_vm3, 1.0, %v5750_v52  ;;  %vm1275_vm10 = vcmp.eq.s32.totalorder %v1245_v34, %v3806_v31 }
 0x119   : > { %vm1276_vm12 = vcmp.eq.s32.totalorder %v1245_v34, %v3809_v50  ;;  %v1211_v58 = vadd.f32 %v2616_v42, %v1059_v43  ;;  %v1212_v16 = vadd.f32 %v2617_v1, %v1060_v51  ;;  %v2647_v22 = vsel %vm1266_vm4, 1.0, %v5750_v52 }
 0x11a   : > { %v2648_v44 = vsel %vm1267_vm7, 1.0, %v5750_v52  ;;  %v2649_v32 = vsel %vm1268_vm8, 1.0, %v5750_v52  ;;  %v4819_v55 = vsel %vm1273_vm9, 1.0, %v5750_v52  ;;  %v4822_v45 = vsel %vm1274_vm11, 1.0, %v5750_v52 }
 0x11b   : > { %v4824_v11 = vadd.f32 %v2646_v12, %v1209_v56  ;;  %v4827_v43 = vsel %vm1275_vm10, 1.0, %v5750_v52  ;;  %v4830_v51 = vsel %vm1276_vm12, 1.0, %v5750_v52  ;;  %vm1421_vm13 = vcmp.eq.s32.totalorder %v1394_v48, %v3798_v46  ;;  %v4850_v56 = vpop.permute.xlu0 %1396 }
 0x11c   : > { %v4833_v33 = vadd.f32 %v2647_v22, %v1210_v38  ;;  %vm697_vm14 = vcmp.eq.s32.totalorder %v669_v24, %v3798_v46  ;;  %vm698_vm15 = vcmp.eq.s32.totalorder %v669_v24, %v3802_v49  ;;  %vm1422_vm0 = vcmp.eq.s32.totalorder %v1394_v48, %v3802_v49  ;;  %v1850_v22 = vld [vmem:[%s5720_s4 + $0x88] sm:$0xff] }
 0x11d   : > { %v789_v34 = vpop.permute.xlu1 %788  ;;  %v4838_v62 = vadd.f32 %v2648_v44, %v1211_v58  ;;  %v4840_v42 = vadd.f32 %v2649_v32, %v1212_v16  ;;  %vm1423_vm1 = vcmp.eq.s32.totalorder %v1394_v48, %v3806_v31  ;;  %vm1424_vm5 = vcmp.eq.s32.totalorder %v1394_v48, %v3809_v50  ;;  %v1849_v16 = vld [vmem:[%s5720_s4 + $0x80] sm:$0xff]  ;;  %v4937_v48 = vld [vmem:[%s5720_s4 + $0x18] sm:$0xff] }
 0x11e   : > { %vm699_vm2 = vcmp.eq.s32.totalorder %v669_v24, %v3806_v31  ;;  %vm700_vm6 = vcmp.eq.s32.totalorder %v669_v24, %v3809_v50  ;;  %vm817_vm3 = vcmp.eq.s32.totalorder %v789_v34, %v3798_v46  ;;  %v4848_v1 = vsel %vm1421_vm13, 1.0, %v5750_v52  ;;  %v1833_v44 = vld [vmem:[%s5720_s4] sm:$0xff]  ;;  %v1851_v24 = vld [vmem:[%s5720_s4 + $0x90] sm:$0xff] }
 0x11f   : > { %v2526_v38 = vsel %vm697_vm14, 1.0, %v5750_v52  ;;  %v4854_v12 = vsel %vm698_vm15, 1.0, %v5750_v52  ;;  %v4857_v58 = vsel %vm1422_vm0, 1.0, %v5750_v52  ;;  %vm1425_vm4 = vcmp.eq.s32.totalorder %v4850_v56, %v3798_v46 }
 0x120   : > { %vm818_vm7 = vcmp.eq.s32.totalorder %v789_v34, %v3802_v49  ;;  %vm819_vm8 = vcmp.eq.s32.totalorder %v789_v34, %v3806_v31  ;;  %vm1426_vm9 = vcmp.eq.s32.totalorder %v4850_v56, %v3802_v49  ;;  %vm1427_vm11 = vcmp.eq.s32.totalorder %v4850_v56, %v3806_v31 }
 0x121   : > { %v2528_v53 = vsel %vm699_vm2, 1.0, %v5750_v52  ;;  %v4893_v6 = vsel %vm700_vm6, 1.0, %v5750_v52  ;;  %vm820_vm10 = vcmp.eq.s32.totalorder %v789_v34, %v3809_v50  ;;  %v2558_v28 = vsel %vm817_vm3, 1.0, %v5750_v52 }
 0x122   : > { %v4872_v32 = vpop.permute.xlu1 %1390  ;;  %v4911_v27 = vsel %vm1423_vm1, 1.0, %v5750_v52  ;;  %v4916_v60 = vsel %vm1424_vm5, 1.0, %v5750_v52  ;;  %vm1428_vm12 = vcmp.eq.s32.totalorder %v4850_v56, %v3809_v50  ;;  %v4924_v29 = vsel %vm1425_vm4, 1.0, %v5750_v52  ;;  %v1869_v56 = vld [vmem:[%s5720_s4 + $0x120] sm:$0xff] }
 0x123   : > { %5828 = vst [vmem:[#allocation24_spill] sm:$0xff] %v4924_v29  ;;  %v2559_v23 = vsel %vm818_vm7, 1.0, %v5750_v52  ;;  %v2560_v35 = vsel %vm819_vm8, 1.0, %v5750_v52  ;;  %v4949_v61 = vsel %vm1426_vm9, 1.0, %v5750_v52  ;;  %v4955_v47 = vsel %vm1427_vm11, 1.0, %v5750_v52 }
 0x124   : > { %5829 = vst [vmem:[#allocation25_spill] sm:$0xff] %v4949_v61  ;;  %v2561_v20 = vsel %vm820_vm10, 1.0, %v5750_v52  ;;  %v913_v37 = vadd.f32 %v2558_v28, %v2526_v38  ;;  %v3068_v15 = vpack.c.bf16 %v1850_v22, %v1849_v16  ;;  %v3070_v4 = vpack.c.bf16 %v1834_v0, %v1833_v44  ;;  %v4969_v28 = vpop.permute.xlu0 %1548  ;;  %v1854_v0 = vld [vmem:[%s5720_s4 + $0xa8] sm:$0xff] }
 0x125   : > { %v3100_v26 = vpack.c.bf16 %v1882_v39, %v1881_v7  ;;  %v3072_v29 = vpack.c.bf16 %v1852_v63, %v1851_v24  ;;  %v3074_v61 = vpack.c.bf16 %v4937_v48, %v4932_v5  ;;  %v1884_v63 = vld [vmem:[%s5720_s4 + $0x198] sm:$0xff]  ;;  %v1853_v39 = vld [vmem:[%s5720_s4 + $0xa0] sm:$0xff]  ;;  %v914_v44 = vadd.f32 %v2559_v23, %v4854_v12  ;;  %v1855_v12 = vld [vmem:[%s5720_s4 + $0xb0] sm:$0xff] }
 0x126   : > { %3069 = vmatprep.subr.bf16.mxu0 %v3068_v15  ;;  %v1868_v5 = vld [vmem:[%s5720_s4 + $0x118] sm:$0xff]  ;;  %vm1577_vm1 = vcmp.eq.s32.totalorder %v4969_v28, %v3798_v46  ;;  %vm1578_vm5 = vcmp.eq.s32.totalorder %v4969_v28, %v3802_v49  ;;  %v5015_v23 = vsel %vm1428_vm12, 1.0, %v5750_v52  ;;  %vm1579_vm2 = vcmp.eq.s32.totalorder %v4969_v28, %v3806_v31  ;;  %v1870_v48 = vld [vmem:[%s5720_s4 + $0x128] sm:$0xff] }
 0x127   : > { %v1692_v13 = vpop.permute.xlu1 %1691  ;;  %3071 = vmatpush3.bf16.msra.mxu0 %v3070_v4  ;;  %3101 = vmatprep.subr.bf16.mxu1 %v3100_v26  ;;  %v1885_v26 = vld [vmem:[%s5720_s4 + $0x1a0] sm:$0xff]  ;;  %v1886_v4 = vld [vmem:[%s5720_s4 + $0x1a8] sm:$0xff]  ;;  %v1856_v24 = vld [vmem:[%s5720_s4 + $0xb8] sm:$0xff]  ;;  %vm1580_vm6 = vcmp.eq.s32.totalorder %v4969_v28, %v3809_v50  ;;  %vm1417_vm3 = vcmp.eq.s32.totalorder %v4872_v32, %v3798_v46  ;;  %vm1418_vm8 = vcmp.eq.s32.totalorder %v4872_v32, %v3802_v49 }
 0x128   : > { %vm1717_vm13 = vcmp.eq.s32.totalorder %v1692_v13, %v3798_v46  ;;  %vm1718_vm14 = vcmp.eq.s32.totalorder %v1692_v13, %v3802_v49  ;;  %vm1719_vm15 = vcmp.eq.s32.totalorder %v1692_v13, %v3806_v31  ;;  %vm1720_vm0 = vcmp.eq.s32.totalorder %v1692_v13, %v3809_v50  ;;  %3103 = vmatpush3.bf16.msra.mxu1 %v3102_v21  ;;  %v1837_v21 = vld [vmem:[%s5720_s4 + $0x20] sm:$0xff] }
 0x129   : > { %v2739_v59 = vsel %vm1718_vm14, 1.0, %v5750_v52  ;;  %v2741_v7 = vsel %vm1720_vm0, 1.0, %v5750_v52  ;;  %v2738_v13 = vsel %vm1717_vm13, 1.0, %v5750_v52  ;;  %v2740_v15 = vsel %vm1719_vm15, 1.0, %v5750_v52  ;;  %3073 = vmatprep.subr.bf16.mxu0 %v3072_v29 }
 0x12a   : > { %v1814_v34 = vadd.f32 %v2739_v59, %v4738_v36  ;;  %v1816_v38 = vadd.f32 %v2741_v7, %v4741_v54  ;;  %v1813_v16 = vadd.f32 %v2738_v13, %v4799_v18  ;;  %v1815_v22 = vadd.f32 %v2740_v15, %v4802_v8  ;;  %v1838_v36 = vld [vmem:[%s5720_s4 + $0x28] sm:$0xff]  ;;  %v1888_v59 = vld [vmem:[%s5720_s4 + $0x1b8] sm:$0xff] }
 0x12b   : > { %v3104_v54 = vpack.c.bf16 %v1884_v63, %v1883_v30  ;;  %v915_v18 = vadd.f32 %v2560_v35, %v2528_v53  ;;  %v3106_v29 = vpack.c.bf16 %v1868_v5, %v1867_v2  ;;  %v3076_v30 = vpack.c.bf16 %v1854_v0, %v1853_v39  ;;  %3075 = vmatpush3.bf16.msra.mxu0 %v3074_v61  ;;  %v1887_v5 = vld [vmem:[%s5720_s4 + $0x1b0] sm:$0xff]  ;;  %v1840_v15 = vld [vmem:[%s5720_s4 + $0x38] sm:$0xff] }
 0x12c   : > { %v1242_v8 = vpop.permute.xlu1 %1241  ;;  %2040 = vmatprep.mubr.f32.mxu0 %v1814_v34  ;;  %2145 = vmatprep.mubr.f32.mxu1 %v1816_v38  ;;  %v916_v35 = vadd.f32 %v2561_v20, %v4893_v6  ;;  %v3108_v53 = vpack.c.bf16 %v1886_v4, %v1885_v26  ;;  %v5830_v20 = vld [vmem:[#allocation31_spill] sm:$0xff]  ;;  %v5043_v63 = vsel %vm1577_vm1, 1.0, %v5750_v52  ;;  %v3078_v2 = vpack.c.bf16 %v1838_v36, %v1837_v21  ;;  %v1872_v26 = vld [vmem:[%s5720_s4 + $0x138] sm:$0xff] }
 0x12d   : > { %2041 = vmatmul.mubr.f32.gmra.mrb[22].mxu0 %v1813_v16  ;;  %2146 = vmatmul.mubr.f32.gmra.mrb[22].mxu1 %v1815_v22  ;;  %v5037_v6 = vadd.f32 %v5830_v20, %v913_v37  ;;  %vm1269_vm4 = vcmp.eq.s32.totalorder %v1242_v8, %v3798_v46  ;;  %vm1270_vm7 = vcmp.eq.s32.totalorder %v1242_v8, %v3802_v49  ;;  %v5831_v37 = vld [vmem:[#allocation32_spill] sm:$0xff]  ;;  %v1839_v61 = vld [vmem:[%s5720_s4 + $0x30] sm:$0xff]  ;;  %v5070_v39 = vsel %vm1578_vm5, 1.0, %v5750_v52 }
 0x12e   : > { %v5054_v7 = vadd.f32 %v5831_v37, %v914_v44  ;;  %3105 = vmatprep.subr.bf16.mxu1 %v3104_v54  ;;  %v3080_v13 = vpack.c.bf16 %v1856_v24, %v1855_v12  ;;  %vm1419_vm9 = vcmp.eq.s32.totalorder %v4872_v32, %v3806_v31  ;;  %3077 = vmatprep.subr.bf16.mxu0 %v3076_v30  ;;  %v2678_v34 = vsel %vm1417_vm3, 1.0, %v5750_v52  ;;  %v1871_v22 = vld [vmem:[%s5720_s4 + $0x130] sm:$0xff] }
 0x12f   : > { %3107 = vmatpush3.bf16.msra.mxu1 %v3106_v29  ;;  %v3110_v0 = vpack.c.bf16 %v1870_v48, %v1869_v56  ;;  %vm1420_vm11 = vcmp.eq.s32.totalorder %v4872_v32, %v3809_v50  ;;  %vm1271_vm10 = vcmp.eq.s32.totalorder %v1242_v8, %v3806_v31  ;;  %v3112_v16 = vpack.c.bf16 %v1888_v59, %v1887_v5  ;;  %v5832_v29 = vld [vmem:[#allocation33_spill] sm:$0xff]  ;;  %v1858_v32 = vld [vmem:[%s5720_s4 + $0xc8] sm:$0xff] }
 0x130   : > { %3109 = vmatprep.subr.bf16.mxu1 %v3108_v53  ;;  %vm1272_vm12 = vcmp.eq.s32.totalorder %v1242_v8, %v3809_v50  ;;  %v2650_v4 = vsel %vm1269_vm4, 1.0, %v5750_v52  ;;  %v2651_v44 = vsel %vm1270_vm7, 1.0, %v5750_v52  ;;  %3079 = vmatpush3.bf16.msra.mxu0 %v3078_v2  ;;  %v3082_v54 = vpack.c.bf16 %v1840_v15, %v1839_v61  ;;  %v1841_v8 = vld [vmem:[%s5720_s4 + $0x40] sm:$0xff]  ;;  %v1842_v2 = vld [vmem:[%s5720_s4 + $0x48] sm:$0xff]  ;;  %v1859_v61 = vld [vmem:[%s5720_s4 + $0xd0] sm:$0xff] }
 0x131   : > { %v5079_v38 = vpop.permute.xlu1 %1542  ;;  %v2679_v21 = vsel %vm1418_vm8, 1.0, %v5750_v52  ;;  %v2680_v36 = vsel %vm1419_vm9, 1.0, %v5750_v52  ;;  %v5103_v30 = vadd.f32 %v5832_v29, %v915_v18  ;;  %v5106_v12 = vadd.f32 %v4417_v10, %v916_v35  ;;  %3081 = vmatprep.subr.bf16.mxu0 %v3080_v13  ;;  %v1889_v5 = vld [vmem:[%s5720_s4 + $0x1c0] sm:$0xff] }
 0x132   : > { %v2681_v24 = vsel %vm1420_vm11, 1.0, %v5750_v52  ;;  %v1513_v53 = vadd.f32 %v2678_v34, %v4824_v11  ;;  %v2652_v56 = vsel %vm1271_vm10, 1.0, %v5750_v52  ;;  %v3114_v48 = vpack.c.bf16 %v1872_v26, %v1871_v22  ;;  %v1857_v11 = vld [vmem:[%s5720_s4 + $0xc0] sm:$0xff] }
 0x133   : > { %3111 = vmatpush3.bf16.msra.mxu1 %v3110_v0  ;;  %v2653_v18 = vsel %vm1272_vm12, 1.0, %v5750_v52  ;;  %v1365_v20 = vadd.f32 %v2650_v4, %v4748_v3  ;;  %v1366_v10 = vadd.f32 %v2651_v44, %v4751_v17  ;;  %vm1570_vm13 = vcmp.eq.s32.totalorder %v5079_v38, %v3802_v49  ;;  %v1873_v13 = vld [vmem:[%s5720_s4 + $0x140] sm:$0xff] }
 0x134   : > { %3113 = vmatprep.subr.bf16.mxu1 %v3112_v16  ;;  %v1514_v3 = vadd.f32 %v2679_v21, %v4833_v33  ;;  %v1515_v17 = vadd.f32 %v2680_v36, %v4838_v62  ;;  %vm1569_vm14 = vcmp.eq.s32.totalorder %v5079_v38, %v3798_v46  ;;  %vm1572_vm15 = vcmp.eq.s32.totalorder %v5079_v38, %v3809_v50  ;;  %v1890_v33 = vld [vmem:[%s5720_s4 + $0x1c8] sm:$0xff]  ;;  %v1860_v16 = vld [vmem:[%s5720_s4 + $0xd8] sm:$0xff] }
 0x135   : > { %3083 = vmatpush3.bf16.msra.mxu0 %v3082_v54  ;;  %v1516_v62 = vadd.f32 %v2681_v24, %v4840_v42  ;;  %v5152_v59 = vsel %vm1579_vm2, 1.0, %v5750_v52  ;;  %v5158_v37 = vsel %vm1580_vm6, 1.0, %v5750_v52  ;;  %v1874_v42 = vld [vmem:[%s5720_s4 + $0x148] sm:$0xff]  ;;  %v307_v15 = vsub.s32 1, %v4794_v40 }
 0x136   : > { %v5136_v35 = vpop.permute.xlu1 %791  ;;  %v5171_v0 = vadd.f32 %v2652_v56, %v4754_v57  ;;  %v5174_v28 = vadd.f32 %v2653_v18, %v4757_v41  ;;  %vm1571_vm0 = vcmp.eq.s32.totalorder %v5079_v38, %v3806_v31  ;;  %v2711_v34 = vsel %vm1570_vm13, 1.0, %v5750_v52  ;;  %v1891_v57 = vld [vmem:[%s5720_s4 + $0x1d0] sm:$0xff]  ;;  %v1892_v41 = vld [vmem:[%s5720_s4 + $0x1d8] sm:$0xff]  ;;  %v5215_v18 = vpop.permute.xlu0 %1551 }
 0x137   : > { %3115 = vmatpush3.bf16.msra.mxu1 %v3114_v48  ;;  %v5192_v22 = vadd.f32 %v4848_v1, %v1365_v20  ;;  %v5195_v26 = vadd.f32 %v4857_v58, %v1366_v10  ;;  %v2710_v4 = vsel %vm1569_vm14, 1.0, %v5750_v52  ;;  %v2713_v44 = vsel %vm1572_vm15, 1.0, %v5750_v52  ;;  %v1843_v1 = vld [vmem:[%s5720_s4 + $0x50] sm:$0xff]  ;;  %v1844_v58 = vld [vmem:[%s5720_s4 + $0x58] sm:$0xff] }
 0x138   : > { %v3084_v54 = vpack.c.bf16 %v1858_v32, %v1857_v11  ;;  %v3086_v21 = vpack.c.bf16 %v1842_v2, %v1841_v8  ;;  %v3116_v36 = vpack.c.bf16 %v1890_v33, %v1889_v5  ;;  %v3118_v29 = vpack.c.bf16 %v1874_v42, %v1873_v13  ;;  %v1875_v38 = vld [vmem:[%s5720_s4 + $0x150] sm:$0xff]  ;;  %v1876_v11 = vld [vmem:[%s5720_s4 + $0x158] sm:$0xff] }
 0x139   : > { %v2712_v24 = vsel %vm1571_vm0, 1.0, %v5750_v52  ;;  %v1666_v48 = vadd.f32 %v2711_v34, %v1514_v3  ;;  %v3088_v20 = vpack.c.bf16 %v1860_v16, %v1859_v61  ;;  %v3120_v10 = vpack.c.bf16 %v1892_v41, %v1891_v57  ;;  %v5261_v41 = vld [vmem:[%s5719_s3] sm:$0xf] }
 0x13a   : > { %3085 = vmatprep.subr.bf16.mxu0 %v3084_v54  ;;  %v1668_v32 = vadd.f32 %v2713_v44, %v1516_v62  ;;  %v1665_v8 = vadd.f32 %v2710_v4, %v1513_v53  ;;  %3117 = vmatprep.subr.bf16.mxu1 %v3116_v36  ;;  %v3090_v3 = vpack.c.bf16 %v1844_v58, %v1843_v1  ;;  %v311_v2 = vsub.s32 2, %v4794_v40 }
 0x13b   : > { %v1093_v56 = vpop.permute.xlu1 %1092  ;;  %3087 = vmatpush3.bf16.msra.mxu0 %v3086_v21  ;;  %v1667_v33 = vadd.f32 %v2712_v24, %v1515_v17  ;;  %vm1581_vm3 = vcmp.eq.s32.totalorder %v5215_v18, %v3798_v46  ;;  %vm1582_vm4 = vcmp.eq.s32.totalorder %v5215_v18, %v3802_v49  ;;  %3119 = vmatpush3.bf16.msra.mxu1 %v3118_v29  ;;  %v5833_v24 = vsub.s32 0, %v4794_v40 }
 0x13c   : > { %vm1121_vm1 = vcmp.eq.s32.totalorder %v1093_v56, %v3798_v46  ;;  %vm1122_vm5 = vcmp.eq.s32.totalorder %v1093_v56, %v3802_v49  ;;  %vm1123_vm2 = vcmp.eq.s32.totalorder %v1093_v56, %v3806_v31  ;;  %vm1124_vm6 = vcmp.eq.s32.totalorder %v1093_v56, %v3809_v50  ;;  %3089 = vmatprep.subr.bf16.mxu0 %v3088_v20 }
 0x13d   : > { %v2622_v5 = vsel %vm1121_vm1, 1.0, %v5750_v52  ;;  %v2623_v62 = vsel %vm1122_vm5, 1.0, %v5750_v52  ;;  %v2624_v53 = vsel %vm1123_vm2, 1.0, %v5750_v52  ;;  %v2625_v13 = vsel %vm1124_vm6, 1.0, %v5750_v52  ;;  %3121 = vmatprep.subr.bf16.mxu1 %v3120_v10 }
 0x13e   : > { %v3122_v17 = vpack.c.bf16 %v1876_v11, %v1875_v38  ;;  %vm821_vm7 = vcmp.eq.s32.totalorder %v5136_v35, %v3798_v46  ;;  %vm822_vm8 = vcmp.eq.s32.totalorder %v5136_v35, %v3802_v49  ;;  %vm823_vm9 = vcmp.eq.s32.totalorder %v5136_v35, %v3806_v31 }
 0x13f   : > { %vm824_vm11 = vcmp.eq.s32.totalorder %v5136_v35, %v3809_v50  ;;  %3091 = vmatpush3.bf16.msra.mxu0 %v3090_v3  ;;  %v1217_v61 = vadd.f32 %v2622_v5, %v5037_v6  ;;  %v1218_v34 = vadd.f32 %v2623_v62, %v5054_v7  ;;  %v1219_v16 = vadd.f32 %v2624_v53, %v5103_v30  ;;  %v5834_v5 = vld [vmem:[#allocation21_spill] sm:$0xff] }
 0x140   : > { %v1695_v42 = vpop.permute.xlu1 %1694  ;;  %v1220_v57 = vadd.f32 %v2625_v13, %v5106_v12  ;;  %3123 = vmatpush3.bf16.msra.mxu1 %v3122_v17  ;;  %v5269_v12 = vadd.f32 %v4911_v27, %v5171_v0  ;;  %v2562_v29 = vsel %vm821_vm7, 1.0, %v5750_v52  ;;  %v2563_v1 = vsel %vm822_vm8, 1.0, %v5750_v52  ;;  %v5836_v53 = vld [vmem:[#allocation25_spill] sm:$0xff] }
 0x141   : > { %vm1721_vm10 = vcmp.eq.s32.totalorder %v1695_v42, %v3798_v46  ;;  %vm1722_vm12 = vcmp.eq.s32.totalorder %v1695_v42, %v3802_v49  ;;  %vm1723_vm13 = vcmp.eq.s32.totalorder %v1695_v42, %v3806_v31  ;;  %vm1724_vm14 = vcmp.eq.s32.totalorder %v1695_v42, %v3809_v50  ;;  %v1846_v42 = vld [vmem:[%s5720_s4 + $0x68] sm:$0xff] }
 0x142   : > { %v2743_v4 = vsel %vm1722_vm12, 1.0, %v5750_v52  ;;  %v2745_v44 = vsel %vm1724_vm14, 1.0, %v5750_v52  ;;  %v2742_v54 = vsel %vm1721_vm10, 1.0, %v5750_v52  ;;  %v2744_v6 = vsel %vm1723_vm13, 1.0, %v5750_v52 }
 0x143   : > { %v1818_v21 = vadd.f32 %v2743_v4, %v1666_v48  ;;  %v1820_v7 = vadd.f32 %v2745_v44, %v1668_v32  ;;  %v1817_v36 = vadd.f32 %v2742_v54, %v1665_v8  ;;  %v1819_v30 = vadd.f32 %v2744_v6, %v1667_v33 }
 0x144   : > { %v5282_v56 = vrot.slane %v5261_v41, %v5833_v24  ;;  %v5286_v27 = vadd.f32 %v4916_v60, %v5174_v28  ;;  %v2564_v0 = vsel %vm823_vm9, 1.0, %v5750_v52  ;;  %v2565_v48 = vsel %vm824_vm11, 1.0, %v5750_v52 }
 0x145   : > { %v944_v58 = vpop.permute.xlu1 %943  ;;  %v1369_v20 = vadd.f32 %v4819_v55, %v1217_v61  ;;  %2045 = vmatprep.mubr.f32.mxu0 %v1818_v21  ;;  %v1370_v10 = vadd.f32 %v4822_v45, %v1218_v34  ;;  %2150 = vmatprep.mubr.f32.mxu1 %v1820_v7  ;;  %vm1583_vm15 = vcmp.eq.s32.totalorder %v5215_v18, %v3806_v31  ;;  %v5304_v60 = vsel %vm1581_vm3, 1.0, %v5750_v52  ;;  %v1861_v55 = vld [vmem:[%s5720_s4 + $0xe0] sm:$0xff]  ;;  %v1862_v45 = vld [vmem:[%s5720_s4 + $0xe8] sm:$0xff] }
 0x146   : > { %2046 = vmatmul.mubr.f32.gmra.mrb[24].mxu0 %v1817_v36  ;;  %v5310_v35 = vsel %vm1582_vm4, 1.0, %v5750_v52  ;;  %v917_v28 = vadd.f32 %v2562_v29, %v4677_v14  ;;  %v918_v38 = vadd.f32 %v2563_v1, %v4765_v19  ;;  %v1371_v11 = vadd.f32 %v4827_v43, %v1219_v16  ;;  %2151 = vmatmul.mubr.f32.gmra.mrb[24].mxu1 %v1819_v30  ;;  %v5835_v14 = vld [vmem:[#allocation24_spill] sm:$0xff]  ;;  %v1893_v61 = vld [vmem:[%s5720_s4 + $0x1e0] sm:$0xff]  ;;  %v5837_v34 = vld [vmem:[#allocation22_spill] sm:$0xff] }
 0x147   : > { %v1372_v32 = vadd.f32 %v4830_v51, %v1220_v57  ;;  %v919_v8 = vadd.f32 %v2564_v0, %v4771_v25  ;;  %v920_v3 = vadd.f32 %v2565_v48, %v4777_v9  ;;  %v5326_v33 = vadd.f32 %v5834_v5, %v5282_v56 }
 0x148   : > { %v5331_v62 = vrot.slane %v5261_v41, %v307_v15  ;;  %v5334_v19 = vadd.f32 %v5835_v14, %v1369_v20  ;;  %vm973_vm0 = vcmp.eq.s32.totalorder %v944_v58, %v3798_v46  ;;  %v315_v51 = vsub.s32 3, %v4794_v40  ;;  %v1845_v15 = vld [vmem:[%s5720_s4 + $0x60] sm:$0xff] }
 0x149   : > { %v3092_v25 = vpack.c.bf16 %v1862_v45, %v1861_v55  ;;  %v5339_v9 = vadd.f32 %v5836_v53, %v1370_v10  ;;  %vm974_vm1 = vcmp.eq.s32.totalorder %v944_v58, %v3802_v49  ;;  %vm975_vm5 = vcmp.eq.s32.totalorder %v944_v58, %v3806_v31  ;;  %v1863_v10 = vld [vmem:[%s5720_s4 + $0xf0] sm:$0xff]  ;;  %v1864_v55 = vld [vmem:[%s5720_s4 + $0xf8] sm:$0xff] }
 0x14a   : > { %v1546_v43 = vpop.permute.xlu1 %1545  ;;  %vm976_vm2 = vcmp.eq.s32.totalorder %v944_v58, %v3809_v50  ;;  %v5348_v13 = vadd.f32 %v4955_v47, %v1371_v11  ;;  %v5351_v17 = vadd.f32 %v5015_v23, %v1372_v32  ;;  %v1894_v47 = vld [vmem:[%s5720_s4 + $0x1e8] sm:$0xff]  ;;  %v2594_v23 = vsel %vm973_vm0, 1.0, %v5750_v52  ;;  %v5838_v11 = vld [vmem:[#allocation27_spill] sm:$0xff] }
 0x14b   : > { %vm1574_vm6 = vcmp.eq.s32.totalorder %v1546_v43, %v3802_v49  ;;  %vm1576_vm3 = vcmp.eq.s32.totalorder %v1546_v43, %v3809_v50  ;;  %3093 = vmatprep.subr.bf16.mxu0 %v3092_v25  ;;  %vm1573_vm4 = vcmp.eq.s32.totalorder %v1546_v43, %v3798_v46  ;;  %vm1575_vm7 = vcmp.eq.s32.totalorder %v1546_v43, %v3806_v31  ;;  %v1895_v53 = vld [vmem:[%s5720_s4 + $0x1f0] sm:$0xff] }
 0x14c   : > { %v5371_v16 = vadd.f32 %v5837_v34, %v5331_v62  ;;  %v2595_v57 = vsel %vm974_vm1, 1.0, %v5750_v52  ;;  %v2596_v4 = vsel %vm975_vm5, 1.0, %v5750_v52  ;;  %v2597_v44 = vsel %vm976_vm2, 1.0, %v5750_v52  ;;  %v5839_v34 = vld [vmem:[#allocation28_spill] sm:$0xff] }
 0x14d   : > { %v5385_v54 = vrot.slane %v5261_v41, %v311_v2  ;;  %v2715_v6 = vsel %vm1574_vm6, 1.0, %v5750_v52  ;;  %v2717_v21 = vsel %vm1576_vm3, 1.0, %v5750_v52  ;;  %v3094_v36 = vpack.c.bf16 %v1846_v42, %v1845_v15  ;;  %v1877_v2 = vld [vmem:[%s5720_s4 + $0x160] sm:$0xff]  ;;  %v1896_v15 = vld [vmem:[%s5720_s4 + $0x1f8] sm:$0xff] }
 0x14e   : > { %v3124_v30 = vpack.c.bf16 %v1894_v47, %v1893_v61  ;;  %v5389_v29 = vadd.f32 %v2594_v23, %v917_v28  ;;  %v2714_v1 = vsel %vm1573_vm4, 1.0, %v5750_v52  ;;  %v2716_v24 = vsel %vm1575_vm7, 1.0, %v5750_v52 }
 0x14f   : > { %v1096_v7 = vpop.permute.xlu1 %1095  ;;  %vm1584_vm8 = vcmp.eq.s32.totalorder %v5215_v18, %v3809_v50  ;;  %v5396_v40 = vrot.slane %v5261_v41, %v315_v51  ;;  %v5401_v58 = vadd.f32 %v2595_v57, %v918_v38  ;;  %v5403_v0 = vadd.f32 %v2596_v4, %v919_v8  ;;  %3095 = vmatpush3.bf16.msra.mxu0 %v3094_v36  ;;  %v1878_v41 = vld [vmem:[%s5720_s4 + $0x168] sm:$0xff] }
 0x150   : > { %v5405_v48 = vadd.f32 %v2597_v44, %v920_v3  ;;  %v5411_v20 = vsel %vm1583_vm15, 1.0, %v5750_v52  ;;  %3125 = vmatprep.subr.bf16.mxu1 %v3124_v30  ;;  %v1670_v45 = vadd.f32 %v2715_v6, %v5195_v26  ;;  %v1672_v28 = vadd.f32 %v2717_v21, %v5286_v27  ;;  %v5840_v6 = vld [vmem:[#allocation29_spill] sm:$0xff] }
 0x151   : > { %v5425_v38 = vmul.f32 0.2, %v5371_v16  ;;  %v5429_v32 = vadd.f32 %v5838_v11, %v5385_v54  ;;  %vm1125_vm9 = vcmp.eq.s32.totalorder %v1096_v7, %v3798_v46  ;;  %vm1126_vm11 = vcmp.eq.s32.totalorder %v1096_v7, %v3802_v49 }
 0x152   : > { %v1669_v8 = vadd.f32 %v2714_v1, %v5192_v22  ;;  %v1671_v3 = vadd.f32 %v2716_v24, %v5269_v12  ;;  %vm1127_vm10 = vcmp.eq.s32.totalorder %v1096_v7, %v3806_v31  ;;  %vm1128_vm12 = vcmp.eq.s32.totalorder %v1096_v7, %v3809_v50  ;;  %v1847_v22 = vld [vmem:[%s5720_s4 + $0x70] sm:$0xff]  ;;  %v1848_v12 = vld [vmem:[%s5720_s4 + $0x78] sm:$0xff] }
 0x153   : > { %v3126_v27 = vpack.c.bf16 %v1878_v41, %v1877_v2  ;;  %v3096_v5 = vpack.c.bf16 %v1864_v55, %v1863_v10  ;;  %v5459_v57 = vadd.f32 %v5839_v34, %v5396_v40  ;;  %v5463_v4 = vadd.f32 %v5070_v39, %v5339_v9  ;;  %v1879_v7 = vld [vmem:[%s5720_s4 + $0x170] sm:$0xff]  ;;  %v1880_v41 = vld [vmem:[%s5720_s4 + $0x178] sm:$0xff] }
 0x154   : > { %v1698_v26 = vpop.permute.xlu1 %1697  ;;  %v5467_v44 = vadd.f32 %v5158_v37, %v5351_v17  ;;  %v5471_v21 = vadd.f32 %v5840_v6, %v5282_v56  ;;  %v2626_v36 = vsel %vm1125_vm9, 1.0, %v5750_v52  ;;  %v2627_v30 = vsel %vm1126_vm11, 1.0, %v5750_v52 }
 0x155   : > { %vm1725_vm13 = vcmp.eq.s32.totalorder %v1698_v26, %v3798_v46  ;;  %vm1726_vm14 = vcmp.eq.s32.totalorder %v1698_v26, %v3802_v49  ;;  %vm1727_vm15 = vcmp.eq.s32.totalorder %v1698_v26, %v3806_v31  ;;  %vm1728_vm0 = vcmp.eq.s32.totalorder %v1698_v26, %v3809_v50  ;;  %3127 = vmatpush3.bf16.msra.mxu1 %v3126_v27 }
 0x156   : > { %v2747_v14 = vsel %vm1726_vm14, 1.0, %v5750_v52  ;;  %v2749_v43 = vsel %vm1728_vm0, 1.0, %v5750_v52  ;;  %v2746_v51 = vsel %vm1725_vm13, 1.0, %v5750_v52  ;;  %v2748_v25 = vsel %vm1727_vm15, 1.0, %v5750_v52  ;;  %3097 = vmatprep.subr.bf16.mxu0 %v3096_v5 }
 0x157   : > { %v1822_v42 = vadd.f32 %v2747_v14, %v1670_v45  ;;  %v1824_v61 = vadd.f32 %v2749_v43, %v1672_v28  ;;  %v1821_v47 = vadd.f32 %v2746_v51, %v1669_v8  ;;  %v1823_v23 = vadd.f32 %v2748_v25, %v1671_v3  ;;  %v5841_v3 = vld [vmem:[#allocation30_spill] sm:$0xff] }
 0x158   : > { %v3098_v39 = vpack.c.bf16 %v1848_v12, %v1847_v22  ;;  %v3128_v9 = vpack.c.bf16 %v1896_v15, %v1895_v53  ;;  %v2628_v37 = vsel %vm1127_vm10, 1.0, %v5750_v52  ;;  %v2629_v17 = vsel %vm1128_vm12, 1.0, %v5750_v52  ;;  %v5842_v15 = vld [vmem:[#allocation35_spill] sm:$0xff] }
 0x159   : > { %v1248_v1 = vpop.permute.xlu1 %1247  ;;  %2050 = vmatprep.mubr.f32.mxu0 %v1822_v42  ;;  %2155 = vmatprep.mubr.f32.mxu1 %v1824_v61  ;;  %v605_v24 = vmax.f32 %v5371_v16, %v5425_v38  ;;  %v2725_v2 = vsel %vm1584_vm8, 1.0, %v5750_v52  ;;  %v1221_v10 = vadd.f32 %v2626_v36, %v5389_v29  ;;  %v1222_v55 = vadd.f32 %v2627_v30, %v5401_v58  ;;  %v5843_v61 = vld [vmem:[#allocation37_spill] sm:$0xff] }
 0x15a   : > { %vm1277_vm1 = vcmp.eq.s32.totalorder %v1248_v1, %v3798_v46  ;;  %2051 = vmatmul.mubr.f32.gmra.mrb[26].mxu0 %v1821_v47  ;;  %vm1278_vm5 = vcmp.eq.s32.totalorder %v1248_v1, %v3802_v49  ;;  %vm1279_vm2 = vcmp.eq.s32.totalorder %v1248_v1, %v3806_v31  ;;  %vm1280_vm6 = vcmp.eq.s32.totalorder %v1248_v1, %v3809_v50 }
 0x15b   : > { %2156 = vmatmul.mubr.f32.gmra.mrb[26].mxu1 %v1823_v23  ;;  %3099 = vmatpush3.bf16.msra.mxu0 %v3098_v39  ;;  %v5504_v45 = vmul.f32 0.2, %v5459_v57  ;;  %v1673_v18 = vadd.f32 %v5043_v63, %v5334_v19  ;;  %v1223_v28 = vadd.f32 %v2628_v37, %v5403_v0  ;;  %v1224_v11 = vadd.f32 %v2629_v17, %v5405_v48 }
 0x15c   : > { %3129 = vmatprep.subr.bf16.mxu1 %v3128_v9  ;;  %v2658_v8 = vsel %vm1277_vm1, 1.0, %v5750_v52  ;;  %v5515_v29 = vadd.f32 %v5841_v3, %v5331_v62  ;;  %v2659_v58 = vsel %vm1278_vm5, 1.0, %v5750_v52  ;;  %v2660_v63 = vsel %vm1279_vm2, 1.0, %v5750_v52 }
 0x15d   : > { %v2661_v19 = vsel %vm1280_vm6, 1.0, %v5750_v52  ;;  %v3130_v48 = vpack.c.bf16 %v1880_v41, %v1879_v7  ;;  %v1373_v12 = vadd.f32 %v2658_v8, %v1221_v10  ;;  %v1374_v14 = vadd.f32 %v2659_v58, %v1222_v55  ;;  %v5844_v8 = vld [vmem:[#allocation39_spill] sm:$0xff] }
 0x15e   : > { %v1400_v0 = vpop.permute.xlu1 %1399  ;;  %v1375_v43 = vadd.f32 %v2660_v63, %v1223_v28  ;;  %v1376_v51 = vadd.f32 %v2661_v19, %v1224_v11  ;;  %v1675_v25 = vadd.f32 %v5152_v59, %v5348_v13  ;;  %v5537_v53 = vmul.f32 0.2, %v5515_v29 }
 0x15f   : > { %vm1429_vm3 = vcmp.eq.s32.totalorder %v1400_v0, %v3798_v46  ;;  %vm1430_vm4 = vcmp.eq.s32.totalorder %v1400_v0, %v3802_v49  ;;  %vm1431_vm7 = vcmp.eq.s32.totalorder %v1400_v0, %v3806_v31  ;;  %vm1432_vm8 = vcmp.eq.s32.totalorder %v1400_v0, %v3809_v50  ;;  %3131 = vmatpush3.bf16.msra.mxu1 %v3130_v48 }
 0x160   : > { %v2690_v26 = vsel %vm1429_vm3, 1.0, %v5750_v52  ;;  %v2691_v27 = vsel %vm1430_vm4, 1.0, %v5750_v52  ;;  %v2692_v5 = vsel %vm1431_vm7, 1.0, %v5750_v52  ;;  %v2693_v22 = vsel %vm1432_vm8, 1.0, %v5750_v52 }
 0x161   : > { %v5541_v42 = vadd.f32 %v5842_v15, %v5396_v40  ;;  %v5545_v47 = vadd.f32 %v5843_v61, %v5331_v62  ;;  %v1525_v23 = vadd.f32 %v2690_v26, %v1373_v12  ;;  %v1526_v34 = vadd.f32 %v2691_v27, %v1374_v14  ;;  %v5847_v26 = vld [vmem:[#allocation41_spill] sm:$0xff]  ;;  %v5850_v15 = vld [vmem:[#allocation11_spill] sm:$0xff] }
 0x162   : > { %v1527_v6 = vadd.f32 %v2692_v5, %v1375_v43  ;;  %v1528_v36 = vadd.f32 %v2693_v22, %v1376_v51  ;;  %v540_v3 = vadd.f32 %v5844_v8, %v5396_v40  ;;  %v574_v58 = vmul.f32 0.2, %v5429_v32 }
 0x163   : > { %v1701_v30 = vpop.permute.xlu1 %1700  ;;  %v1677_v41 = vadd.f32 %v5304_v60, %v1525_v23  ;;  %v1678_v10 = vadd.f32 %v5310_v35, %v1526_v34  ;;  %v576_v19 = vmul.f32 0.2, %v5471_v21  ;;  %v609_v0 = vmax.f32 %v5515_v29, %v5537_v53  ;;  %v5848_v29 = vld [vmem:[#allocation9_spill] sm:$0xff]  ;;  %v5851_v23 = vld [vmem:[#allocation40_spill] sm:$0xff] }
 0x164   : > { %vm1729_vm9 = vcmp.eq.s32.totalorder %v1701_v30, %v3798_v46  ;;  %vm1730_vm11 = vcmp.eq.s32.totalorder %v1701_v30, %v3802_v49  ;;  %vm1731_vm10 = vcmp.eq.s32.totalorder %v1701_v30, %v3806_v31  ;;  %vm1732_vm12 = vcmp.eq.s32.totalorder %v1701_v30, %v3809_v50 }
 0x165   : > { %v2751_v59 = vsel %vm1730_vm11, 1.0, %v5750_v52  ;;  %v2753_v13 = vsel %vm1732_vm12, 1.0, %v5750_v52  ;;  %v2750_v1 = vsel %vm1729_vm9, 1.0, %v5750_v52  ;;  %v2752_v39 = vsel %vm1731_vm10, 1.0, %v5750_v52 }
 0x166   : > { %v1826_v9 = vadd.f32 %v2751_v59, %v5463_v4  ;;  %v1828_v37 = vadd.f32 %v2753_v13, %v5467_v44  ;;  %v1825_v17 = vadd.f32 %v2750_v1, %v1673_v18  ;;  %v1827_v7 = vadd.f32 %v2752_v39, %v1675_v25  ;;  %v5849_v25 = vld [vmem:[#allocation38_spill] sm:$0xff] }
 0x167   : > { %v1679_v55 = vadd.f32 %v5411_v20, %v1527_v6  ;;  %v1680_v28 = vadd.f32 %v2725_v2, %v1528_v36  ;;  %v1704_v11 = vpop.permute.xlu1 %1703  ;;  %v579_v18 = vmul.f32 0.2, %v5541_v42  ;;  %v581_v48 = vmul.f32 0.2, %v5545_v47  ;;  %v5852_v6 = vld [vmem:[#allocation6_spill] sm:$0xff] }
 0x168   : > { %vm1733_vm13 = vcmp.eq.s32.totalorder %v1704_v11, %v3798_v46  ;;  %vm1734_vm14 = vcmp.eq.s32.totalorder %v1704_v11, %v3802_v49  ;;  %vm1735_vm15 = vcmp.eq.s32.totalorder %v1704_v11, %v3806_v31  ;;  %vm1736_vm0 = vcmp.eq.s32.totalorder %v1704_v11, %v3809_v50  ;;  %2055 = vmatprep.mubr.f32.mxu0 %v1826_v9  ;;  %v5853_v59 = vld [vmem:[#allocation42_spill] sm:$0xff] }
 0x169   : > { %v2754_v4 = vsel %vm1733_vm13, 1.0, %v5750_v52  ;;  %v2755_v44 = vsel %vm1734_vm14, 1.0, %v5750_v52  ;;  %v2756_v60 = vsel %vm1735_vm15, 1.0, %v5750_v52  ;;  %v2757_v35 = vsel %vm1736_vm0, 1.0, %v5750_v52  ;;  %2160 = vmatprep.mubr.f32.mxu1 %v1828_v37  ;;  %2056 = vmatmul.mubr.f32.gmra.mrb[28].mxu0 %v1825_v17  ;;  %v5845_v52 = vld [vmem:[#allocation34_spill] sm:$0xff]  ;;  %v5855_v17 = vld [vmem:[#allocation5_spill] sm:$0xff] }
 0x16a   : > { %2161 = vmatmul.mubr.f32.gmra.mrb[28].mxu1 %v1827_v7  ;;  %v1830_v20 = vadd.f32 %v2755_v44, %v1678_v10  ;;  %v1832_v46 = vadd.f32 %v2757_v35, %v1680_v28  ;;  %v1829_v2 = vadd.f32 %v2754_v4, %v1677_v41  ;;  %v1831_v49 = vadd.f32 %v2756_v60, %v1679_v55  ;;  %v5854_v13 = vld [vmem:[#allocation10_spill] sm:$0xff]  ;;  %v5856_v28 = vld [vmem:[#allocation13_spill] sm:$0xff]  ;;  %v5857_v60 = vld [vmem:[#allocation12_spill] sm:$0xff] }
 0x16b   : > { %v572_v31 = vmul.f32 0.2, %v5326_v33  ;;  %v607_v50 = vmax.f32 %v5459_v57, %v5504_v45  ;;  %v532_v63 = vadd.f32 %v5845_v52, %v5385_v54  ;;  %v5846_v57 = vld [vmem:[#allocation36_spill] sm:$0xff]  ;;  %v433_v27 = vadd.f32 %v5847_v26, %v5331_v62  ;;  %v5860_v52 = vld [vmem:[#allocation43_spill] sm:$0xff] }
 0x16c   : > { %2060 = vmatprep.mubr.f32.mxu0 %v1830_v20  ;;  %2165 = vmatprep.mubr.f32.mxu1 %v1832_v46  ;;  %v425_v45 = vadd.f32 %v5846_v57, %v5282_v56  ;;  %v611_v22 = vmax.f32 %v5541_v42, %v579_v18  ;;  %v583_v12 = vmul.f32 0.2, %v540_v3  ;;  %v546_v14 = vadd.f32 %v5848_v29, %v5396_v40  ;;  %v5861_v57 = vld [vmem:[#allocation7_spill] sm:$0xff] }
 0x16d   : > { %2061 = vmatmul.mubr.f32.gmra.mrb[30].mxu0 %v1829_v2  ;;  %v604_v5 = vmax.f32 %v5326_v33, %v572_v31  ;;  %v606_v43 = vmax.f32 %v5429_v32, %v574_v58  ;;  %v578_v51 = vmul.f32 0.2, %v532_v63  ;;  %v538_v53 = vadd.f32 %v5849_v25, %v5385_v54  ;;  %v5858_v2 = vld [vmem:[#allocation8_spill] sm:$0xff]  ;;  %v5864_v25 = vld [vmem:[#allocation23_spill] sm:$0xff] }
 0x16e   : > { %2166 = vmatmul.mubr.f32.gmra.mrb[30].mxu1 %v1831_v49  ;;  %2235 = vmatprep.mubr.f32.mxu0 %v605_v24  ;;  %v608_v16 = vmax.f32 %v5471_v21, %v576_v19  ;;  %v580_v38 = vmul.f32 0.2, %v425_v45  ;;  %v613_v24 = vmax.f32 %v5545_v47, %v581_v48  ;;  %v585_v33 = vmul.f32 0.2, %v433_v27 }
 0x16f   : > { %2340 = vmatprep.mubr.f32.mxu1 %v607_v50  ;;  %v439_v42 = vadd.f32 %v5850_v15, %v5331_v62  ;;  %v615_v61 = vmax.f32 %v540_v3, %v583_v12  ;;  %v431_v32 = vadd.f32 %v5851_v23, %v5282_v56  ;;  %v587_v34 = vmul.f32 0.2, %v546_v14  ;;  %v5859_v50 = vld [vmem:[#allocation15_spill] sm:$0xff] }
 0x170   : > { %v552_v36 = vadd.f32 %v5852_v6, %v5396_v40  ;;  %v610_v21 = vmax.f32 %v532_v63, %v578_v51  ;;  %v582_v30 = vmul.f32 0.2, %v538_v53  ;;  %v544_v47 = vadd.f32 %v5853_v59, %v5385_v54 }
 0x171   : > { %2236 = vmatmul.mubr.f32.vlgmr.msra.gmra.mrb[32].mxu0 %v604_v5  ;;  %v437_v1 = vadd.f32 %v5854_v13, %v5282_v56  ;;  %v612_v39 = vmax.f32 %v425_v45, %v580_v38  ;;  %v617_v9 = vmax.f32 %v433_v27, %v585_v33  ;;  %v589_v37 = vmul.f32 0.2, %v439_v42 }
 0x172   : > { %2341 = vmatmul.mubr.f32.vlgmr.msra.gmra.mrb[32].mxu1 %v606_v43  ;;  %2240 = vmatprep.mubr.f32.mxu0 %v609_v0  ;;  %v445_v7 = vadd.f32 %v5855_v17, %v5331_v62  ;;  %v584_v41 = vmul.f32 0.2, %v431_v32  ;;  %v619_v10 = vmax.f32 %v546_v14, %v587_v34  ;;  %v591_v55 = vmul.f32 0.2, %v552_v36  ;;  %v5863_v14 = vld [vmem:[#allocation14_spill] sm:$0xff] }
 0x173   : > { %2345 = vmatprep.mubr.f32.mxu1 %v611_v22  ;;  %v558_v11 = vadd.f32 %v5856_v28, %v5396_v40  ;;  %v614_v4 = vmax.f32 %v538_v53, %v582_v30  ;;  %v586_v44 = vmul.f32 0.2, %v544_v47  ;;  %v550_v35 = vadd.f32 %v5857_v60, %v5385_v54  ;;  %v5862_v22 = vld [vmem:[#allocation18_spill] sm:$0xff] }
 0x174   : > { %v588_v20 = vmul.f32 0.2, %v437_v1  ;;  %v621_v46 = vmax.f32 %v439_v42, %v589_v37  ;;  %v443_v49 = vadd.f32 %v5858_v2, %v5282_v56  ;;  %v593_v31 = vmul.f32 0.2, %v445_v7 }
 0x175   : > { %2241 = vmatmul.mubr.f32.gmra.mrb[34].mxu0 %v608_v16  ;;  %v451_v18 = vadd.f32 %v5859_v50, %v5331_v62  ;;  %v616_v8 = vmax.f32 %v431_v32, %v584_v41  ;;  %v623_v3 = vmax.f32 %v552_v36, %v591_v55  ;;  %v595_v58 = vmul.f32 0.2, %v558_v11  ;;  %v5866_v32 = vld [vmem:[#allocation44_spill] sm:$0xff] }
 0x176   : > { %2346 = vmatmul.mubr.f32.gmra.mrb[34].mxu1 %v610_v21  ;;  %2245 = vmatprep.mubr.f32.mxu0 %v613_v24  ;;  %v564_v63 = vadd.f32 %v5860_v52, %v5396_v40  ;;  %v618_v19 = vmax.f32 %v544_v47, %v586_v44  ;;  %v590_v0 = vmul.f32 0.2, %v550_v35  ;;  %v556_v45 = vadd.f32 %v5861_v57, %v5385_v54  ;;  %v5865_v24 = vld [vmem:[#allocation16_spill] sm:$0xff] }
 0x177   : > { %2350 = vmatprep.mubr.f32.mxu1 %v615_v61  ;;  %v620_v48 = vmax.f32 %v437_v1, %v588_v20  ;;  %v592_v26 = vmul.f32 0.2, %v443_v49  ;;  %v625_v27 = vmax.f32 %v445_v7, %v593_v31  ;;  %v597_v5 = vmul.f32 0.2, %v451_v18  ;;  %v5867_v21 = vld [vmem:[#allocation20_spill] sm:$0xff] }
 0x178   : > { %v457_v12 = vadd.f32 %v5862_v22, %v5331_v62  ;;  %v627_v29 = vmax.f32 %v558_v11, %v595_v58  ;;  %v449_v43 = vadd.f32 %v5863_v14, %v5282_v56  ;;  %v599_v51 = vmul.f32 0.2, %v564_v63 }
 0x179   : > { %2246 = vmatmul.mubr.f32.gmra.mrb[36].mxu0 %v612_v39  ;;  %v570_v53 = vadd.f32 %v5864_v25, %v5396_v40  ;;  %v622_v16 = vmax.f32 %v550_v35, %v590_v0  ;;  %v594_v38 = vmul.f32 0.2, %v556_v45  ;;  %v562_v33 = vadd.f32 %v5865_v24, %v5385_v54 }
 0x17a   : > { %2351 = vmatmul.mubr.f32.gmra.mrb[36].mxu1 %v614_v4  ;;  %2250 = vmatprep.mubr.f32.mxu0 %v617_v9  ;;  %v624_v15 = vmax.f32 %v443_v49, %v592_v26  ;;  %v629_v42 = vmax.f32 %v451_v18, %v597_v5  ;;  %v601_v61 = vmul.f32 0.2, %v457_v12  ;;  %v596_v62 = vmul.f32 0.2, %v449_v43 }
 0x17b   : > { %2355 = vmatprep.mubr.f32.mxu1 %v619_v10  ;;  %v631_v23 = vmax.f32 %v564_v63, %v599_v51  ;;  %v455_v34 = vadd.f32 %v5866_v32, %v5282_v56  ;;  %v603_v6 = vmul.f32 0.2, %v570_v53  ;;  %v626_v36 = vmax.f32 %v556_v45, %v594_v38 }
 0x17c   : > { %v598_v40 = vmul.f32 0.2, %v562_v33  ;;  %v568_v30 = vadd.f32 %v5867_v21, %v5385_v54  ;;  %v633_v59 = vmax.f32 %v457_v12, %v601_v61  ;;  %v628_v47 = vmax.f32 %v449_v43, %v596_v62 }
 0x17d   : > { %2251 = vmatmul.mubr.f32.gmra.mrb[38].mxu0 %v616_v8  ;;  %v600_v13 = vmul.f32 0.2, %v455_v34  ;;  %v635_v1 = vmax.f32 %v570_v53, %v603_v6 }
 0x17e   : > { %2356 = vmatmul.mubr.f32.gmra.mrb[38].mxu1 %v618_v19  ;;  %2255 = vmatprep.mubr.f32.mxu0 %v621_v46  ;;  %v630_v39 = vmax.f32 %v562_v33, %v598_v40  ;;  %v602_v9 = vmul.f32 0.2, %v568_v30 }
 0x17f   : > { %2360 = vmatprep.mubr.f32.mxu1 %v623_v3  ;;  %v632_v56 = vmax.f32 %v455_v34, %v600_v13 }
 0x180   : > { %v634_v37 = vmax.f32 %v568_v30, %v602_v9 }
 0x181   : > { %2256 = vmatmul.mubr.f32.gmra.mrb[40].mxu0 %v620_v48 }
 0x182   : > { %2361 = vmatmul.mubr.f32.gmra.mrb[40].mxu1 %v622_v16  ;;  %2260 = vmatprep.mubr.f32.mxu0 %v625_v27 }
 0x183   : > { %2365 = vmatprep.mubr.f32.mxu1 %v627_v29 }
 0x185   : > { %2261 = vmatmul.mubr.f32.gmra.mrb[42].mxu0 %v624_v15 }
 0x186   : > { %2366 = vmatmul.mubr.f32.gmra.mrb[42].mxu1 %v626_v36  ;;  %2265 = vmatprep.mubr.f32.mxu0 %v629_v42 }
 0x187   : > { %2370 = vmatprep.mubr.f32.mxu1 %v631_v23 }
 0x189   : > { %2266 = vmatmul.mubr.f32.gmra.mrb[44].mxu0 %v628_v47 }
 0x18a   : > { %2371 = vmatmul.mubr.f32.gmra.mrb[44].mxu1 %v630_v39  ;;  %2270 = vmatprep.mubr.f32.mxu0 %v633_v59 }
 0x18b   : > { %2375 = vmatprep.mubr.f32.mxu1 %v635_v1 }
 0x18d   : > { %2271 = vmatmul.mubr.f32.gmra.mrb[46].mxu0 %v632_v56 }
 0x18e   : > { %2376 = vmatmul.mubr.f32.gmra.mrb[46].mxu1 %v634_v37 }
 0x1bf   : > { %v2796_v17 = vpop.f32.mrb[16].mxu0 }
 0x1c0   : > { %v2852_v54 = vpop.f32.mrb[16].mxu1  ;;  %v2797_v7 = vpop.f32.mrb[17].mxu0 }
 0x1c1   : > { %v2798_v41 = vadd.f32 %v2797_v7, %v2796_v17  ;;  %v2853_v10 = vpop.f32.mrb[17].mxu1 }
 0x1c2   : > { %v2854_v55 = vadd.f32 %v2853_v10, %v2852_v54 }
 0x1c4   : > { %v2133_v28 = vadd.f32 %v2854_v55, %v2798_v41 }
 0x1d0   : > { %v2799_v11 = vpop.f32.mrb[18].mxu0  ;;  %v2855_v4 = vpop.f32.mrb[18].mxu1 }
 0x1d1   : > { %v2800_v44 = vpop.f32.mrb[19].mxu0  ;;  %v2856_v60 = vpop.f32.mrb[19].mxu1 }
 0x1d2   : > { %v2801_v35 = vadd.f32 %v2800_v44, %v2799_v11  ;;  %v2857_v20 = vadd.f32 %v2856_v60, %v2855_v4 }
 0x1d4   : > { %v2138_v46 = vadd.f32 %v2857_v20, %v2801_v35 }
 0x1dc   : > { %v2802_v2 = vpop.f32.mrb[20].mxu0  ;;  %v2858_v49 = vpop.f32.mrb[20].mxu1 }
 0x1dd   : > { %v2803_v31 = vpop.f32.mrb[21].mxu0  ;;  %v2859_v50 = vpop.f32.mrb[21].mxu1 }
 0x1de   : > { %v2804_v18 = vadd.f32 %v2803_v31, %v2802_v2  ;;  %v2860_v8 = vadd.f32 %v2859_v50, %v2858_v49 }
 0x1e0   : > { %v5633_v3 = vadd.f32 %v2860_v8, %v2804_v18 }
 0x200   : > { %v2805_v58 = vpop.f32.mrb[22].mxu0  ;;  %v2861_v52 = vpop.f32.mrb[22].mxu1 }
 0x201   : > { %v2806_v63 = vpop.f32.mrb[23].mxu0  ;;  %v2862_v0 = vpop.f32.mrb[23].mxu1 }
 0x202   : > { %v2807_v19 = vadd.f32 %v2806_v63, %v2805_v58  ;;  %v2863_v57 = vadd.f32 %v2862_v0, %v2861_v52 }
 0x204   : > { %v5635_v45 = vadd.f32 %v2863_v57, %v2807_v19 }
 0x219   : > { %v2808_v48 = vpop.f32.mrb[24].mxu0  ;;  %v2864_v26 = vpop.f32.mrb[24].mxu1 }
 0x21a   : > { %v2809_v27 = vpop.f32.mrb[25].mxu0  ;;  %v2865_v22 = vpop.f32.mrb[25].mxu1 }
 0x21b   : > { %v2810_v5 = vadd.f32 %v2809_v27, %v2808_v48  ;;  %v2866_v12 = vadd.f32 %v2865_v22, %v2864_v26 }
 0x21d   : > { %v5637_v29 = vadd.f32 %v2866_v12, %v2810_v5 }
 0x22d   : > { %v2811_v14 = vpop.f32.mrb[26].mxu0 }
 0x22e   : > { %v2867_v43 = vpop.f32.mrb[26].mxu1  ;;  %v2812_v51 = vpop.f32.mrb[27].mxu0 }
 0x22f   : > { %v2813_v25 = vadd.f32 %v2812_v51, %v2811_v14  ;;  %v2868_v53 = vpop.f32.mrb[27].mxu1 }
 0x230   : > { %v2869_v16 = vadd.f32 %v2868_v53, %v2867_v43 }
 0x232   : > { %v5639_v38 = vadd.f32 %v2869_v16, %v2813_v25 }
 0x23c   : > { %v2814_v24 = vpop.f32.mrb[28].mxu0 }
 0x23d   : > { %v2870_v33 = vpop.f32.mrb[28].mxu1  ;;  %v2815_v15 = vpop.f32.mrb[29].mxu0 }
 0x23e   : > { %v2816_v42 = vadd.f32 %v2815_v15, %v2814_v24  ;;  %v2871_v61 = vpop.f32.mrb[29].mxu1 }
 0x23f   : > { %v2872_v62 = vadd.f32 %v2871_v61, %v2870_v33 }
 0x240   : > { %v2817_v23 = vpop.f32.mrb[30].mxu0 }
 0x241   : > { %v5641_v32 = vadd.f32 %v2872_v62, %v2816_v42  ;;  %v2873_v34 = vpop.f32.mrb[30].mxu1  ;;  %v2818_v6 = vpop.f32.mrb[31].mxu0 }
 0x242   : > { %v2819_v36 = vadd.f32 %v2818_v6, %v2817_v23  ;;  %v2874_v40 = vpop.f32.mrb[31].mxu1 }
 0x243   : > { %v2875_v21 = vadd.f32 %v2874_v40, %v2873_v34 }
 0x244   : > { %v2908_v30 = vpop.f32.mrb[32].mxu0 }
 0x245   : > { %v5644_v59 = vadd.f32 %v2875_v21, %v2819_v36  ;;  %v2964_v47 = vpop.f32.mrb[32].mxu1  ;;  %v2909_v13 = vpop.f32.mrb[33].mxu0 }
 0x246   : > { %v2910_v1 = vadd.f32 %v2909_v13, %v2908_v30  ;;  %v2965_v39 = vpop.f32.mrb[33].mxu1 }
 0x247   : > { %v2966_v9 = vadd.f32 %v2965_v39, %v2964_v47 }
 0x248   : > { %v2238_v56 = vadd.f32 %v2910_v1, %v2133_v28  ;;  %v2911_v37 = vpop.f32.mrb[34].mxu0 }
 0x249   : > { %v2967_v17 = vpop.f32.mrb[34].mxu1  ;;  %v2912_v54 = vpop.f32.mrb[35].mxu0 }
 0x24a   : > { %v2343_v7 = vadd.f32 %v2966_v9, %v2238_v56  ;;  %v2913_v41 = vadd.f32 %v2912_v54, %v2911_v37  ;;  %v2968_v10 = vpop.f32.mrb[35].mxu1 }
 0x24b   : > { %v2969_v55 = vadd.f32 %v2968_v10, %v2967_v17 }
 0x24c   : > { %2381 = vst [vmem:[%s5648_s16] sm:$0xff] %v2343_v7  ;;  %v2243_v11 = vadd.f32 %v2913_v41, %v2138_v46  ;;  %v2914_v4 = vpop.f32.mrb[36].mxu0 }
 0x24d   : > { %v2970_v44 = vpop.f32.mrb[36].mxu1  ;;  %v2915_v60 = vpop.f32.mrb[37].mxu0 }
 0x24e   : > { %v2348_v35 = vadd.f32 %v2969_v55, %v2243_v11  ;;  %v2916_v20 = vadd.f32 %v2915_v60, %v2914_v4  ;;  %v2971_v28 = vpop.f32.mrb[37].mxu1 }
 0x24f   : > { %v2972_v2 = vadd.f32 %v2971_v28, %v2970_v44 }
 0x250   : > { %2382 = vst [vmem:[%s5648_s16 + $0x8] sm:$0xff] %v2348_v35  ;;  %v2248_v49 = vadd.f32 %v2916_v20, %v5633_v3  ;;  %v2917_v31 = vpop.f32.mrb[38].mxu0 }
 0x251   : > { %v2973_v50 = vpop.f32.mrb[38].mxu1  ;;  %v2918_v18 = vpop.f32.mrb[39].mxu0 }
 0x252   : > { %v2353_v8 = vadd.f32 %v2972_v2, %v2248_v49  ;;  %v2919_v58 = vadd.f32 %v2918_v18, %v2917_v31  ;;  %v2974_v52 = vpop.f32.mrb[39].mxu1 }
 0x253   : > { %v2975_v63 = vadd.f32 %v2974_v52, %v2973_v50 }
 0x254   : > { %2383 = vst [vmem:[%s5648_s16 + $0x10] sm:$0xff] %v2353_v8  ;;  %v2253_v46 = vadd.f32 %v2919_v58, %v5635_v45  ;;  %v2920_v19 = vpop.f32.mrb[40].mxu0 }
 0x255   : > { %v2976_v0 = vpop.f32.mrb[40].mxu1  ;;  %v2921_v57 = vpop.f32.mrb[41].mxu0 }
 0x256   : > { %v2358_v48 = vadd.f32 %v2975_v63, %v2253_v46  ;;  %v2922_v26 = vadd.f32 %v2921_v57, %v2920_v19  ;;  %v2977_v27 = vpop.f32.mrb[41].mxu1 }
 0x257   : > { %v2978_v5 = vadd.f32 %v2977_v27, %v2976_v0 }
 0x258   : > { %2384 = vst [vmem:[%s5648_s16 + $0x18] sm:$0xff] %v2358_v48  ;;  %v2258_v3 = vadd.f32 %v2922_v26, %v5637_v29  ;;  %v2923_v22 = vpop.f32.mrb[42].mxu0 }
 0x259   : > { %v2979_v12 = vpop.f32.mrb[42].mxu1  ;;  %v2924_v14 = vpop.f32.mrb[43].mxu0 }
 0x25a   : > { %v2363_v43 = vadd.f32 %v2978_v5, %v2258_v3  ;;  %v2925_v51 = vadd.f32 %v2924_v14, %v2923_v22  ;;  %v2980_v25 = vpop.f32.mrb[43].mxu1 }
 0x25b   : > { %v2981_v53 = vadd.f32 %v2980_v25, %v2979_v12 }
 0x25c   : > { %2385 = vst [vmem:[%s5648_s16 + $0x20] sm:$0xff] %v2363_v43  ;;  %v2263_v45 = vadd.f32 %v2925_v51, %v5639_v38  ;;  %v2926_v16 = vpop.f32.mrb[44].mxu0 }
 0x25d   : > { %v2982_v24 = vpop.f32.mrb[44].mxu1  ;;  %v2927_v33 = vpop.f32.mrb[45].mxu0 }
 0x25e   : > { %v2368_v15 = vadd.f32 %v2981_v53, %v2263_v45  ;;  %v2928_v42 = vadd.f32 %v2927_v33, %v2926_v16  ;;  %v2983_v29 = vpop.f32.mrb[45].mxu1 }
 0x25f   : > { %v2984_v61 = vadd.f32 %v2983_v29, %v2982_v24 }
 0x260   : > { %2386 = vst [vmem:[%s5648_s16 + $0x28] sm:$0xff] %v2368_v15  ;;  %v2268_v62 = vadd.f32 %v2928_v42, %v5641_v32  ;;  %v2929_v23 = vpop.f32.mrb[46].mxu0 }
 0x261   : > { %v2985_v34 = vpop.f32.mrb[46].mxu1  ;;  %v2930_v6 = vpop.f32.mrb[47].mxu0 }
 0x262   : > { %v2373_v38 = vadd.f32 %v2984_v61, %v2268_v62  ;;  %v2931_v36 = vadd.f32 %v2930_v6, %v2929_v23  ;;  %v2986_v40 = vpop.f32.mrb[47].mxu1 }
 0x263   : > { %v2987_v21 = vadd.f32 %v2986_v40, %v2985_v34 }
 0x264   : > { %2387 = vst [vmem:[%s5648_s16 + $0x30] sm:$0xff] %v2373_v38  ;;  %v2273_v30 = vadd.f32 %v2931_v36, %v5644_v59 }
 0x266   : > { %v2378_v32 = vadd.f32 %v2987_v21, %v2273_v30 }
 0x268   : > { %2388 = vst [vmem:[%s5648_s16 + $0x38] sm:$0xff] %v2378_v32 }
 0x269   : > { %3247 = shalt.err (!%p3244_p3)
}
 0x26a   : > { %s3248_s11 = scalar_lea.hbm %s5668_s26, 1024  ;;  %s3252_s14 = scalar_lea.hbm %s5722_s6, 8192 }
 0x26b   : > { %p3249_p4 = scmp.ne.s32.totalorder %s5668_s26, %s3248_s11  ;;  %p3253_p9 = scmp.lt.u32.totalorder %s5668_s26, %s5722_s6 }
 0x26c   : > { %p3254_p10 = scmp.lt.u32.totalorder %s3252_s14, %s3248_s11  ;;  %p3256_p12 = scmp.lt.u32.totalorder %s3248_s11, %s5668_s26 }
 0x26d   : > { %p3250_p7 = pnand %p3249_p4, %p3383_p5 }
 0x26e   : > { %p3255_p11 = por %p3254_p10, %p3253_p9 }
 0x26f   : > { %p3251_p8 = pneg %p3250_p7 }
 0x270   : > { %p3257_p13 = por %p3256_p12, %p3255_p11 }
 0x272   : > { %p3258_p0 = pnand %p3257_p13, %p3251_p8 }
 0x274   : > { %3261 = shalt.err (!%p3258_p0)
}
 0x275   : > { %s3308_s17 = smov 128   ;;  %s3309_s20 = smov 8  }
 0x276   : > { %3132 = dma.vmem_to_hbm [thread:$0]  (%p3383_p5), %s5670_s19, 1024, %s5668_s26, %s5675_s28, %s3308_s17, %s3308_s17, %s3309_s20  }
 0x277 PF: > { %p3138_p1 = scmp.ge.s32.totalorder %s3296_s24, 2  ;;  %s2418_s18 = sand.u32 1, %s3284_s21  }
 0x278   : > { %s2419_s25 = scalar_lea.sflag [#allocation3], %s2418_s18 }
 0x279   : > { %p3135_p2 = pnand %p3138_p1, %p3387_p6 }
 0x27b   : > { %3279 = dma.done.wait (!%p3135_p2), %s2419_s25, 1024  }
 0x27c   : > { %3281 = vsyncadd (!%p3135_p2), %s2419_s25, 4294966272  ;;  %p16_p3 = scmp.ge.s32.totalorder %s3370_s27, 10   ;;  %s5868_s21 = smov %s3288_s22 }
 0x27d   : > { %s5869_s22 = smov %s3292_s23  ;;  %s5870_s23 = smov %s3381_s30 }
 0x27e   : > { %s5871_s24 = smov %s3370_s27  ;;  %18 = sbr.rel (!%p16_p3) target bundleno = 3 (0x3), region = 82 }
 0x285   :  { %2424 = vsyncpa [#allocation3], 1 }
 0x286   :  { %2426 = vsyncpa [#allocation3 + $0x1], 1 }

</bundles_post_ra>
